<compile_context>
chip_gen: v7x
topology: tpu7x:2x2x1
jax: 0.10.0
libtpu: 0.0.40
codegen_flags: <defaults>
</compile_context>

<pallas_src>
import functools

import jax
import jax.numpy as jnp
from jax import lax
from jax.experimental import pallas as pl
from jax.experimental.pallas import tpu as pltpu


VMEM_LIMIT = 48 * 1024 * 1024          # <= ~48 MiB: safe on v7x, roomy on v5e/v6e


def _make_divisible(v, divisor=8, min_value=None):
    if min_value is None:
        min_value = divisor
    new_v = max(min_value, int(v + divisor / 2) // divisor * divisor)
    if new_v < 0.9 * v:
        new_v += divisor
    return new_v


def _hard_sigmoid(v):
    return jnp.clip(v + 3.0, 0.0, 6.0) * (1.0 / 6.0)


def _hard_swish(v):
    return v * _hard_sigmoid(v)


# ----------------------- shared in-kernel building blocks -------------------- #
def _depthwise_bn_hswish(x_img, xpad_ref, w_dw, bn_s, bn_b, *, k, stride, pad,
                         h_in, w_in):
    """Depthwise KxK conv + BN + HardSwish for one NHWC image.

    x_img: (h_in, w_in, C) values (compute dtype); returns f32 (h_out, w_out, C).
    xpad_ref: VMEM scratch (h_in+2p, w_in+2p, C) in compute dtype.
    """
    hp, wp = h_in + 2 * pad, w_in + 2 * pad
    ws = wp - k + 1                               # stride-1 output width
    h_out = (hp - k) // stride + 1
    c = x_img.shape[-1]
    dt = xpad_ref.dtype

    # Zero only the pad border (perimeter), not the whole scratch; done every
    # grid step (no program_id gating -> safe under megacore scratch duplication).
    if pad > 0:
        xpad_ref[pl.ds(0, pad), :, :] = jnp.zeros((pad, wp, c), dt)
        xpad_ref[pl.ds(hp - pad, pad), :, :] = jnp.zeros((pad, wp, c), dt)
        xpad_ref[pl.ds(pad, h_in), pl.ds(0, pad), :] = jnp.zeros((h_in, pad, c), dt)
        xpad_ref[pl.ds(pad, h_in), pl.ds(wp - pad, pad), :] = (
            jnp.zeros((h_in, pad, c), dt))
        xpad_ref[pl.ds(pad, h_in), pl.ds(pad, w_in), :] = x_img.astype(dt)
    else:
        xpad_ref[...] = x_img.astype(dt)

    # Tap loop: accumulate in a local register value (single write at the end,
    # no per-tap VMEM read-modify-write).  For stride>1 only the h_out needed
    # rows per tap enter the accumulator (major-axis subselect is free); only
    # the W (sublane) subsample is deferred to a single slice at the end.
    span = (h_out - 1) * stride + 1
    acc = jnp.zeros((h_out, ws, c), jnp.float32)
    for dy in range(k):
        for dx in range(k):
            win = xpad_ref[pl.ds(dy, span), pl.ds(dx, ws), :]
            if stride > 1:
                win = lax.slice(win, (0, 0, 0), win.shape, (stride, 1, 1))
            acc = acc + win.astype(jnp.float32) * w_dw[dy, dx, :]
    if stride > 1:
        acc = lax.slice(acc, (0, 0, 0), (h_out, ws, c), (1, stride, 1))

    h = acc * bn_s + bn_b
    return _hard_swish(h)


def _pointwise_f32(h, w_pw, c_in):
    """1x1 pointwise conv.  h: (th, w, C) in compute dtype; returns f32."""
    if c_in <= 8:
        # Tiny channel counts only (demo sizes): a handful of VPU FMAs beats a
        # sub-128-lane matmul + relayout.  Realistic LCNet widths take the MXU.
        hf = h.astype(jnp.float32)
        out = jnp.zeros(hf.shape[:2] + (w_pw.shape[1],), jnp.float32)
        for ci in range(c_in):
            out = out + hf[:, :, ci:ci + 1] * w_pw[ci, :]
        return out
    th, w, cc = h.shape
    # MXU matmul fed at the activation dtype (bf16 on v6e/v7x when
    # compute_dtype=bf16) with f32 accumulation.
    w_cast = w_pw.astype(h.dtype)
    return jnp.dot(h.reshape(th * w, cc), w_cast,
                   preferred_element_type=jnp.float32).reshape(th, w, -1)


# --------------------------- pass 1: depthwise (SE) -------------------------- #
def _dw_kernel(x_ref, wdw_ref, bn1s_ref, bn1b_ref, h_ref, mean_ref, xpad_ref,
               *, k, stride, pad, h_in, w_in):
    h = _depthwise_bn_hswish(x_ref[0], xpad_ref, wdw_ref[...],
                             bn1s_ref[0], bn1b_ref[0],
                             k=k, stride=stride, pad=pad, h_in=h_in, w_in=w_in)
    h_ref[0] = h.astype(h_ref.dtype)
    # Per-batch channel mean for the SE layer (computed from the f32 h).
    inv_n = 1.0 / float(h.shape[0] * h.shape[1])
    mean_ref[...] = (jnp.sum(h, axis=(0, 1)) * inv_n).reshape(1, 1, -1)


# --------------------------- pass 2: pointwise (SE) -------------------------- #
def _pw_kernel(h_ref, se_ref, wpw_ref, bn2s_ref, bn2b_ref, o_ref, *, c_in):
    h = h_ref[0]                                        # (th, w, C) compute dtype
    h = h * se_ref[0, 0].astype(h.dtype)                # SE scale applied to h
    out = _pointwise_f32(h, wpw_ref[...], c_in)
    out = out * bn2s_ref[0] + bn2b_ref[0]
    out = _hard_swish(out)
    o_ref[0] = out.astype(o_ref.dtype)


# ---------------------- fused single pass (use_se=False) --------------------- #
def _fused_kernel(x_ref, wdw_ref, bn1s_ref, bn1b_ref, wpw_ref, bn2s_ref,
                  bn2b_ref, o_ref, xpad_ref,
                  *, k, stride, pad, h_in, w_in, c_in, mxu_dtype):
    h = _depthwise_bn_hswish(x_ref[0], xpad_ref, wdw_ref[...],
                             bn1s_ref[0], bn1b_ref[0],
                             k=k, stride=stride, pad=pad, h_in=h_in, w_in=w_in)
    out = _pointwise_f32(h.astype(mxu_dtype), wpw_ref[...], c_in)
    out = out * bn2s_ref[0] + bn2b_ref[0]
    out = _hard_swish(out)
    o_ref[0] = out.astype(o_ref.dtype)


# --------------------------------- wrapper ---------------------------------- #
def _pick_row_tile(h_out, w_out, c, oup, act_bytes, weight_bytes, vmem_limit):
    """Largest divisor of h_out with 2x(in block)+2x(out block)+weight <= ~1/3 VMEM."""
    budget = vmem_limit // 3
    best = 1
    for d in range(1, h_out + 1):
        if h_out % d:
            continue
        tot = 2 * d * w_out * (c * act_bytes + oup * 4) + weight_bytes
        if tot <= budget:
            best = d
    return best


def depsep_conv(x_nchw, params, *, kernel_size, stride, use_se,
                compute_dtype=jnp.float32, row_tile=None,
                out_dtype=jnp.float32):
    """DepSepConv forward.  Input/output are NCHW (PyTorch layout)."""
    b, c, h, w = x_nchw.shape
    pad = (kernel_size - 1) // 2
    h_out = (h + 2 * pad - kernel_size) // stride + 1
    w_out = (w + 2 * pad - kernel_size) // stride + 1
    oup = params["w_pw"].shape[1]

    # NHWC internally: channels on the lane axis -> depthwise taps only shift
    # along major/sublane axes (plain vector loads, no lane rotates).
    x = jnp.transpose(x_nchw, (0, 2, 3, 1)).astype(compute_dtype)
    hp, wp = h + 2 * pad, w + 2 * pad

    if not use_se:
        # No global pooling barrier -> fuse depthwise and pointwise in one
        # kernel per image; h never round-trips through HBM.
        fk = functools.partial(_fused_kernel, k=kernel_size, stride=stride,
                               pad=pad, h_in=h, w_in=w, c_in=c,
                               mxu_dtype=compute_dtype)
        out_nhwc = pl.pallas_call(
            fk,
            out_shape=jax.ShapeDtypeStruct((b, h_out, w_out, oup), out_dtype),
            grid=(b,),
            in_specs=[
                pl.BlockSpec((1, h, w, c), lambda bi: (bi, 0, 0, 0)),
                pl.BlockSpec((kernel_size, kernel_size, c), lambda bi: (0, 0, 0)),
                pl.BlockSpec((1, c), lambda bi: (0, 0)),
                pl.BlockSpec((1, c), lambda bi: (0, 0)),
                pl.BlockSpec((c, oup), lambda bi: (0, 0)),
                pl.BlockSpec((1, oup), lambda bi: (0, 0)),
                pl.BlockSpec((1, oup), lambda bi: (0, 0)),
            ],
            out_specs=pl.BlockSpec((1, h_out, w_out, oup),
                                   lambda bi: (bi, 0, 0, 0)),
            scratch_shapes=[pltpu.VMEM((hp, wp, c), compute_dtype)],
            compiler_params=pltpu.CompilerParams(
                dimension_semantics=("parallel",),
                vmem_limit_bytes=VMEM_LIMIT),
        )(x, params["w_dw"], params["bn1_scale"], params["bn1_bias"],
          params["w_pw"], params["bn2_scale"], params["bn2_bias"])
        return jnp.transpose(out_nhwc, (0, 3, 1, 2))

    # ---- pass 1: depthwise + BN + hswish + per-batch channel means ---------- #
    dw = functools.partial(_dw_kernel, k=kernel_size, stride=stride, pad=pad,
                           h_in=h, w_in=w)
    h_int, ch_mean = pl.pallas_call(
        dw,
        out_shape=(jax.ShapeDtypeStruct((b, h_out, w_out, c), compute_dtype),
                   jax.ShapeDtypeStruct((b, 1, c), jnp.float32)),
        grid=(b,),
        in_specs=[
            pl.BlockSpec((1, h, w, c), lambda bi: (bi, 0, 0, 0)),
            pl.BlockSpec((kernel_size, kernel_size, c), lambda bi: (0, 0, 0)),
            pl.BlockSpec((1, c), lambda bi: (0, 0)),
            pl.BlockSpec((1, c), lambda bi: (0, 0)),
        ],
        out_specs=[pl.BlockSpec((1, h_out, w_out, c), lambda bi: (bi, 0, 0, 0)),
                   pl.BlockSpec((1, 1, c), lambda bi: (bi, 0, 0))],
        scratch_shapes=[pltpu.VMEM((hp, wp, c), compute_dtype)],
        compiler_params=pltpu.CompilerParams(
            dimension_semantics=("parallel",),
            vmem_limit_bytes=VMEM_LIMIT),
    )(x, params["w_dw"], params["bn1_scale"], params["bn1_bias"])

    # SE layer: the two tiny (1,C) FCs run in plain JAX (M=1 matmuls off the
    # MXU).  The per-(batch,channel) scale is passed into pass 2 as a tiny
    # (B,1,C) input; w_pw stays a single shared block (no (B,C,oup) in HBM).
    m = ch_mean[:, 0, :]                                          # (B, C)
    s = jnp.maximum(m @ params["fc1_w"] + params["fc1_b"], 0.0)
    s = _hard_sigmoid(s @ params["fc2_w"] + params["fc2_b"])      # (B, C)
    se = s.reshape(b, 1, c)

    # ---- pass 2: SE scale + pointwise + BN + hswish, row-tiled -------------- #
    act_bytes = jnp.dtype(compute_dtype).itemsize
    weight_bytes = c * oup * 4
    th = row_tile if row_tile is not None else _pick_row_tile(
        h_out, w_out, c, oup, act_bytes, weight_bytes, VMEM_LIMIT)
    assert h_out % th == 0, (h_out, th)

    pw = functools.partial(_pw_kernel, c_in=c)
    out_nhwc = pl.pallas_call(
        pw,
        out_shape=jax.ShapeDtypeStruct((b, h_out, w_out, oup), out_dtype),
        grid=(b, h_out // th),
        in_specs=[
            pl.BlockSpec((1, th, w_out, c), lambda bi, ti: (bi, ti, 0, 0)),
            pl.BlockSpec((1, 1, c), lambda bi, ti: (bi, 0, 0)),
            pl.BlockSpec((c, oup), lambda bi, ti: (0, 0)),
            pl.BlockSpec((1, oup), lambda bi, ti: (0, 0)),
            pl.BlockSpec((1, oup), lambda bi, ti: (0, 0)),
        ],
        out_specs=pl.BlockSpec((1, th, w_out, oup),
                               lambda bi, ti: (bi, ti, 0, 0)),
        compiler_params=pltpu.CompilerParams(
            dimension_semantics=("parallel", "parallel"),
            vmem_limit_bytes=VMEM_LIMIT),
    )(h_int, se, params["w_pw"], params["bn2_scale"], params["bn2_bias"])

    return jnp.transpose(out_nhwc, (0, 3, 1, 2))                  # NCHW


# ----------------------------- pure-JAX reference --------------------------- #
def depsep_reference(x, params, *, kernel_size, stride, use_se):
    pad = (kernel_size - 1) // 2
    c = x.shape[1]
    oup = params["w_pw"].shape[1]
    w_dw = jnp.transpose(params["w_dw"], (2, 0, 1))[:, None]      # (C,1,k,k)
    y = lax.conv_general_dilated(x, w_dw, (stride, stride),
                                 [(pad, pad), (pad, pad)],
                                 feature_group_count=c,
                                 dimension_numbers=("NCHW", "OIHW", "NCHW"))
    y = y * params["bn1_scale"].reshape(1, c, 1, 1) + params["bn1_bias"].reshape(1, c, 1, 1)
    y = y * jnp.clip(y + 3, 0, 6) / 6
    if use_se:
        s = jnp.mean(y, axis=(2, 3))                              # (B, C)
        s = jnp.maximum(s @ params["fc1_w"] + params["fc1_b"], 0)
        s = s @ params["fc2_w"] + params["fc2_b"]
        s = jnp.clip(s + 3, 0, 6) / 6
        y = y * s[:, :, None, None]
    z = jnp.einsum("bchw,co->bohw", y, params["w_pw"])
    z = z * params["bn2_scale"].reshape(1, oup, 1, 1) + params["bn2_bias"].reshape(1, oup, 1, 1)
    z = z * jnp.clip(z + 3, 0, 6) / 6
    return z


# --------------------------------- parameters ------------------------------- #
def make_params(key, inp, oup, kernel_size):
    hid = _make_divisible(inp // 4)
    ks = jax.random.split(key, 10)
    eps = 1e-5

    def bn(kk, n):
        gamma = 1.0 + 0.1 * jax.random.normal(kk[0], (n,), jnp.float32)
        beta = 0.1 * jax.random.normal(kk[1], (n,), jnp.float32)
        mean = 0.1 * jax.random.normal(kk[2], (n,), jnp.float32)
        var = jnp.abs(jax.random.normal(kk[3], (n,), jnp.float32)) + 0.5
        scale = gamma / jnp.sqrt(var + eps)
        bias = beta - mean * scale
        return scale.reshape(1, n), bias.reshape(1, n)

    bn1_scale, bn1_bias = bn(jax.random.split(ks[0], 4), inp)
    bn2_scale, bn2_bias = bn(jax.random.split(ks[1], 4), oup)

    return dict(
        w_dw=0.2 * jax.random.normal(ks[2], (kernel_size, kernel_size, inp), jnp.float32),
        bn1_scale=bn1_scale, bn1_bias=bn1_bias,
        fc1_w=0.3 * jax.random.normal(ks[3], (inp, hid), jnp.float32),
        fc1_b=0.05 * jax.random.normal(ks[4], (1, hid), jnp.float32),
        fc2_w=0.3 * jax.random.normal(ks[5], (hid, inp), jnp.float32),
        fc2_b=0.05 * jax.random.normal(ks[6], (1, inp), jnp.float32),
        w_pw=0.2 * jax.random.normal(ks[7], (inp, oup), jnp.float32),
        bn2_scale=bn2_scale, bn2_bias=bn2_bias,
    )


if __name__ == "__main__":
    key = jax.random.PRNGKey(0)
    kx, kp, kx2, kp2 = jax.random.split(key, 4)

    B, INP, OUP, H, W = 2, 4, 8, 16, 16
    x = jax.random.normal(kx, (B, INP, H, W), jnp.float32)
    params = make_params(kp, INP, OUP, 3)

    # Config 1: stride 1, SE on (two-pass path), f32, row-tiled pointwise.
    run_f32 = jax.jit(functools.partial(depsep_conv, kernel_size=3, stride=1,
                                        use_se=True, row_tile=8))
    out = jax.block_until_ready(run_f32(x, params))
    ref = jax.block_until_ready(depsep_reference(x, params, kernel_size=3,
                                                 stride=1, use_se=True))
    assert out.shape == (B, OUP, H, W), out.shape
    assert jnp.allclose(out, ref, atol=2e-4, rtol=2e-4), \
        float(jnp.max(jnp.abs(out - ref)))

    # Config 2: stride 2, no SE -> fully fused single kernel (no h HBM trip).
    run_s2 = jax.jit(functools.partial(depsep_conv, kernel_size=3, stride=2,
                                       use_se=False))
    out2 = jax.block_until_ready(run_s2(x, params))
    ref2 = jax.block_until_ready(depsep_reference(x, params, kernel_size=3,
                                                  stride=2, use_se=False))
    assert out2.shape == (B, OUP, H // 2, W // 2), out2.shape
    assert jnp.allclose(out2, ref2, atol=2e-4, rtol=2e-4), \
        float(jnp.max(jnp.abs(out2 - ref2)))

    # Config 3: bf16 activations with f32 accumulation (v6e/v7x memory-bound
    # configuration); loose check against the f32 reference.
    run_bf16 = jax.jit(functools.partial(depsep_conv, kernel_size=3, stride=1,
                                         use_se=True, row_tile=8,
                                         compute_dtype=jnp.bfloat16))
    out3 = jax.block_until_ready(run_bf16(x, params))
    assert out3.shape == (B, OUP, H, W), out3.shape
    assert float(jnp.max(jnp.abs(out3 - ref))) < 0.25

    # Config 4: realistic channel widths (C=OUP=128) -> exercises the MXU
    # pointwise path and the SE-scale-on-h formulation, auto row tile.
    B4, C4, O4 = 2, 128, 128
    x4 = jax.random.normal(kx2, (B4, C4, H, W), jnp.float32)
    params4 = make_params(kp2, C4, O4, 3)
    run_mxu = jax.jit(functools.partial(depsep_conv, kernel_size=3, stride=1,
                                        use_se=True))
    out4 = jax.block_until_ready(run_mxu(x4, params4))
    ref4 = jax.block_until_ready(depsep_reference(x4, params4, kernel_size=3,
                                                  stride=1, use_se=True))
    assert out4.shape == (B4, O4, H, W), out4.shape
    assert jnp.allclose(out4, ref4, atol=2e-3, rtol=2e-3), \
        float(jnp.max(jnp.abs(out4 - ref4)))

    print("KERNEL_OK")
</pallas_src>

<mosaic_0001>
module attributes {stable_mosaic.version = 11 : i64} {
  func.func @_pw_kernel(%arg0: i32, %arg1: i32, %arg2: memref<1x8x16x4xf32, #tpu.memory_space<vmem>>, %arg3: memref<1x1x4xf32, #tpu.memory_space<vmem>>, %arg4: memref<4x8xf32, #tpu.memory_space<vmem>>, %arg5: memref<1x8xf32, #tpu.memory_space<vmem>>, %arg6: memref<1x8xf32, #tpu.memory_space<vmem>>, %arg7: memref<1x8x16x8xf32, #tpu.memory_space<vmem>>) attributes {dimension_semantics = [#tpu.dimension_semantics<parallel>, #tpu.dimension_semantics<parallel>], iteration_bounds = array<i64: 2, 2>, scalar_prefetch = 0 : i64, scratch_operands = 0 : i64, tpu.core_type = #tpu.core_type<tc>, window_params = [{transform_indices = @transform_0, window_bounds = array<i64: 1, 8, 16, 4>}, {transform_indices = @transform_1, window_bounds = array<i64: 1, 1, 4>}, {pipeline_mode = #tpu.pipeline_mode<synchronous>, transform_indices = @transform_2, window_bounds = array<i64: 4, 8>}, {pipeline_mode = #tpu.pipeline_mode<synchronous>, transform_indices = @transform_3, window_bounds = array<i64: 1, 8>}, {pipeline_mode = #tpu.pipeline_mode<synchronous>, transform_indices = @transform_4, window_bounds = array<i64: 1, 8>}, {transform_indices = @transform_5, window_bounds = array<i64: 1, 8, 16, 8>}]} {
    %c0 = arith.constant 0 : index
    %c0_0 = arith.constant 0 : index
    %c0_1 = arith.constant 0 : index
    %c0_2 = arith.constant 0 : index
    %0 = vector.load %arg2[%c0, %c0_0, %c0_1, %c0_2] : memref<1x8x16x4xf32, #tpu.memory_space<vmem>>, vector<1x8x16x4xf32>
    %1 = vector.shape_cast %0 : vector<1x8x16x4xf32> to vector<8x16x4xf32>
    %c0_3 = arith.constant 0 : index
    %c0_4 = arith.constant 0 : index
    %c0_5 = arith.constant 0 : index
    %2 = vector.load %arg3[%c0_3, %c0_4, %c0_5] : memref<1x1x4xf32, #tpu.memory_space<vmem>>, vector<1x1x4xf32>
    %3 = vector.shape_cast %2 : vector<1x1x4xf32> to vector<4xf32>
    %4 = vector.shape_cast %3 : vector<4xf32> to vector<1x1x4xf32>
    %5 = vector.broadcast %4 : vector<1x1x4xf32> to vector<8x16x4xf32>
    %6 = arith.mulf %1, %5 : vector<8x16x4xf32>
    %c0_6 = arith.constant 0 : index
    %c0_7 = arith.constant 0 : index
    %7 = vector.load %arg4[%c0_6, %c0_7] : memref<4x8xf32, #tpu.memory_space<vmem>>, vector<4x8xf32>
    %cst = arith.constant 0.000000e+00 : f32
    %8 = vector.broadcast %cst : f32 to vector<8x16x8xf32>
    %9 = vector.extract_strided_slice %6 {offsets = [0, 0, 0], sizes = [8, 16, 1], strides = [1, 1, 1]} : vector<8x16x4xf32> to vector<8x16x1xf32>
    %10 = vector.extract_strided_slice %7 {offsets = [0, 0], sizes = [1, 8], strides = [1, 1]} : vector<4x8xf32> to vector<1x8xf32>
    %11 = vector.shape_cast %10 : vector<1x8xf32> to vector<8xf32>
    %12 = vector.shape_cast %11 : vector<8xf32> to vector<1x1x8xf32>
    %13 = vector.broadcast %9 : vector<8x16x1xf32> to vector<8x16x8xf32>
    %14 = vector.broadcast %12 : vector<1x1x8xf32> to vector<8x16x8xf32>
    %15 = arith.mulf %13, %14 : vector<8x16x8xf32>
    %16 = arith.addf %8, %15 : vector<8x16x8xf32>
    %17 = vector.extract_strided_slice %6 {offsets = [0, 0, 1], sizes = [8, 16, 1], strides = [1, 1, 1]} : vector<8x16x4xf32> to vector<8x16x1xf32>
    %18 = vector.extract_strided_slice %7 {offsets = [1, 0], sizes = [1, 8], strides = [1, 1]} : vector<4x8xf32> to vector<1x8xf32>
    %19 = vector.shape_cast %18 : vector<1x8xf32> to vector<8xf32>
    %20 = vector.shape_cast %19 : vector<8xf32> to vector<1x1x8xf32>
    %21 = vector.broadcast %17 : vector<8x16x1xf32> to vector<8x16x8xf32>
    %22 = vector.broadcast %20 : vector<1x1x8xf32> to vector<8x16x8xf32>
    %23 = arith.mulf %21, %22 : vector<8x16x8xf32>
    %24 = arith.addf %16, %23 : vector<8x16x8xf32>
    %25 = vector.extract_strided_slice %6 {offsets = [0, 0, 2], sizes = [8, 16, 1], strides = [1, 1, 1]} : vector<8x16x4xf32> to vector<8x16x1xf32>
    %26 = vector.extract_strided_slice %7 {offsets = [2, 0], sizes = [1, 8], strides = [1, 1]} : vector<4x8xf32> to vector<1x8xf32>
    %27 = vector.shape_cast %26 : vector<1x8xf32> to vector<8xf32>
    %28 = vector.shape_cast %27 : vector<8xf32> to vector<1x1x8xf32>
    %29 = vector.broadcast %25 : vector<8x16x1xf32> to vector<8x16x8xf32>
    %30 = vector.broadcast %28 : vector<1x1x8xf32> to vector<8x16x8xf32>
    %31 = arith.mulf %29, %30 : vector<8x16x8xf32>
    %32 = arith.addf %24, %31 : vector<8x16x8xf32>
    %33 = vector.extract_strided_slice %6 {offsets = [0, 0, 3], sizes = [8, 16, 1], strides = [1, 1, 1]} : vector<8x16x4xf32> to vector<8x16x1xf32>
    %34 = vector.extract_strided_slice %7 {offsets = [3, 0], sizes = [1, 8], strides = [1, 1]} : vector<4x8xf32> to vector<1x8xf32>
    %35 = vector.shape_cast %34 : vector<1x8xf32> to vector<8xf32>
    %36 = vector.shape_cast %35 : vector<8xf32> to vector<1x1x8xf32>
    %37 = vector.broadcast %33 : vector<8x16x1xf32> to vector<8x16x8xf32>
    %38 = vector.broadcast %36 : vector<1x1x8xf32> to vector<8x16x8xf32>
    %39 = arith.mulf %37, %38 : vector<8x16x8xf32>
    %40 = arith.addf %32, %39 : vector<8x16x8xf32>
    %c0_8 = arith.constant 0 : index
    %c0_9 = arith.constant 0 : index
    %41 = vector.load %arg5[%c0_8, %c0_9] : memref<1x8xf32, #tpu.memory_space<vmem>>, vector<1x8xf32>
    %42 = vector.shape_cast %41 : vector<1x8xf32> to vector<8xf32>
    %43 = vector.shape_cast %42 : vector<8xf32> to vector<1x1x8xf32>
    %44 = vector.broadcast %43 : vector<1x1x8xf32> to vector<8x16x8xf32>
    %45 = arith.mulf %40, %44 : vector<8x16x8xf32>
    %c0_10 = arith.constant 0 : index
    %c0_11 = arith.constant 0 : index
    %46 = vector.load %arg6[%c0_10, %c0_11] : memref<1x8xf32, #tpu.memory_space<vmem>>, vector<1x8xf32>
    %47 = vector.shape_cast %46 : vector<1x8xf32> to vector<8xf32>
    %48 = vector.shape_cast %47 : vector<8xf32> to vector<1x1x8xf32>
    %49 = vector.broadcast %48 : vector<1x1x8xf32> to vector<8x16x8xf32>
    %50 = arith.addf %45, %49 : vector<8x16x8xf32>
    %cst_12 = arith.constant 3.000000e+00 : f32
    %51 = vector.broadcast %cst_12 : f32 to vector<8x16x8xf32>
    %52 = arith.addf %50, %51 : vector<8x16x8xf32>
    %cst_13 = arith.constant 0.000000e+00 : f32
    %cst_14 = arith.constant 6.000000e+00 : f32
    %53 = vector.broadcast %cst_13 : f32 to vector<8x16x8xf32>
    %54 = arith.maximumf %53, %52 : vector<8x16x8xf32>
    %55 = vector.broadcast %cst_14 : f32 to vector<8x16x8xf32>
    %56 = arith.minimumf %55, %54 : vector<8x16x8xf32>
    %cst_15 = arith.constant 0.166666672 : f32
    %57 = vector.broadcast %cst_15 : f32 to vector<8x16x8xf32>
    %58 = arith.mulf %56, %57 : vector<8x16x8xf32>
    %59 = arith.mulf %50, %58 : vector<8x16x8xf32>
    %c0_16 = arith.constant 0 : index
    %c0_17 = arith.constant 0 : index
    %c0_18 = arith.constant 0 : index
    %c0_19 = arith.constant 0 : index
    %60 = vector.load %arg7[%c0_16, %c0_17, %c0_18, %c0_19] : memref<1x8x16x8xf32, #tpu.memory_space<vmem>>, vector<1x8x16x8xf32>
    %61 = vector.shape_cast %60 : vector<1x8x16x8xf32> to vector<8x16x8xf32>
    %62 = vector.shape_cast %59 : vector<8x16x8xf32> to vector<1x8x16x8xf32>
    tpu.vector_store %arg7[%c0_16, %c0_17, %c0_18, %c0_19], %62 {strides = array<i32>} : memref<1x8x16x8xf32, #tpu.memory_space<vmem>>, vector<1x8x16x8xf32>,
    return
  }
  func.func @transform_0(%arg0: i32, %arg1: i32) -> (i32, i32, i32, i32) {
    %c0_i32 = arith.constant 0 : i32
    %c0_i32_0 = arith.constant 0 : i32
    %c0_i32_1 = arith.constant 0 : i32
    return %arg0, %arg1, %c0_i32, %c0_i32_0 : i32, i32, i32, i32
  }
  func.func @transform_1(%arg0: i32, %arg1: i32) -> (i32, i32, i32) {
    %c0_i32 = arith.constant 0 : i32
    %c0_i32_0 = arith.constant 0 : i32
    %c0_i32_1 = arith.constant 0 : i32
    return %arg0, %c0_i32, %c0_i32_0 : i32, i32, i32
  }
  func.func @transform_2(%arg0: i32, %arg1: i32) -> (i32, i32) {
    %c0_i32 = arith.constant 0 : i32
    %c0_i32_0 = arith.constant 0 : i32
    %c0_i32_1 = arith.constant 0 : i32
    return %c0_i32, %c0_i32_0 : i32, i32
  }
  func.func @transform_3(%arg0: i32, %arg1: i32) -> (i32, i32) {
    %c0_i32 = arith.constant 0 : i32
    %c0_i32_0 = arith.constant 0 : i32
    %c0_i32_1 = arith.constant 0 : i32
    return %c0_i32, %c0_i32_0 : i32, i32
  }
  func.func @transform_4(%arg0: i32, %arg1: i32) -> (i32, i32) {
    %c0_i32 = arith.constant 0 : i32
    %c0_i32_0 = arith.constant 0 : i32
    %c0_i32_1 = arith.constant 0 : i32
    return %c0_i32, %c0_i32_0 : i32, i32
  }
  func.func @transform_5(%arg0: i32, %arg1: i32) -> (i32, i32, i32, i32) {
    %c0_i32 = arith.constant 0 : i32
    %c0_i32_0 = arith.constant 0 : i32
    %c0_i32_1 = arith.constant 0 : i32
    return %arg0, %arg1, %c0_i32, %c0_i32_0 : i32, i32, i32, i32
  }
}

module attributes {stable_mosaic.version = 11 : i64} {
  func.func @_dw_kernel(%arg0: i32, %arg1: memref<1x16x16x4xf32, #tpu.memory_space<vmem>>, %arg2: memref<3x3x4xf32, #tpu.memory_space<vmem>>, %arg3: memref<1x4xf32, #tpu.memory_space<vmem>>, %arg4: memref<1x4xf32, #tpu.memory_space<vmem>>, %arg5: memref<1x16x16x4xf32, #tpu.memory_space<vmem>>, %arg6: memref<1x1x4xf32, #tpu.memory_space<vmem>>, %arg7: memref<18x18x4xf32, #tpu.memory_space<vmem>>) attributes {dimension_semantics = [#tpu.dimension_semantics<parallel>], iteration_bounds = array<i64: 2>, scalar_prefetch = 0 : i64, scratch_operands = 1 : i64, tpu.core_type = #tpu.core_type<tc>, window_params = [{transform_indices = @transform_0, window_bounds = array<i64: 1, 16, 16, 4>}, {pipeline_mode = #tpu.pipeline_mode<synchronous>, transform_indices = @transform_1, window_bounds = array<i64: 3, 3, 4>}, {pipeline_mode = #tpu.pipeline_mode<synchronous>, transform_indices = @transform_2, window_bounds = array<i64: 1, 4>}, {pipeline_mode = #tpu.pipeline_mode<synchronous>, transform_indices = @transform_3, window_bounds = array<i64: 1, 4>}, {transform_indices = @transform_4, window_bounds = array<i64: 1, 16, 16, 4>}, {transform_indices = @transform_5, window_bounds = array<i64: 1, 1, 4>}]} {
    %c0 = arith.constant 0 : index
    %c0_0 = arith.constant 0 : index
    %c0_1 = arith.constant 0 : index
    %c0_2 = arith.constant 0 : index
    %0 = vector.load %arg1[%c0, %c0_0, %c0_1, %c0_2] : memref<1x16x16x4xf32, #tpu.memory_space<vmem>>, vector<1x16x16x4xf32>
    %1 = vector.shape_cast %0 : vector<1x16x16x4xf32> to vector<16x16x4xf32>
    %c0_3 = arith.constant 0 : index
    %c0_4 = arith.constant 0 : index
    %c0_5 = arith.constant 0 : index
    %2 = vector.load %arg2[%c0_3, %c0_4, %c0_5] : memref<3x3x4xf32, #tpu.memory_space<vmem>>, vector<3x3x4xf32>
    %c0_6 = arith.constant 0 : index
    %c0_7 = arith.constant 0 : index
    %3 = vector.load %arg3[%c0_6, %c0_7] : memref<1x4xf32, #tpu.memory_space<vmem>>, vector<1x4xf32>
    %4 = vector.shape_cast %3 : vector<1x4xf32> to vector<4xf32>
    %c0_8 = arith.constant 0 : index
    %c0_9 = arith.constant 0 : index
    %5 = vector.load %arg4[%c0_8, %c0_9] : memref<1x4xf32, #tpu.memory_space<vmem>>, vector<1x4xf32>
    %6 = vector.shape_cast %5 : vector<1x4xf32> to vector<4xf32>
    %cst = arith.constant 0.000000e+00 : f32
    %7 = vector.broadcast %cst : f32 to vector<1x18x4xf32>
    %c0_10 = arith.constant 0 : index
    %c0_11 = arith.constant 0 : index
    %c0_12 = arith.constant 0 : index
    %8 = vector.load %arg7[%c0_10, %c0_11, %c0_12] : memref<18x18x4xf32, #tpu.memory_space<vmem>>, vector<1x18x4xf32>
    tpu.vector_store %arg7[%c0_10, %c0_11, %c0_12], %7 {strides = array<i32>} : memref<18x18x4xf32, #tpu.memory_space<vmem>>, vector<1x18x4xf32>,
    %cst_13 = arith.constant 0.000000e+00 : f32
    %9 = vector.broadcast %cst_13 : f32 to vector<1x18x4xf32>
    %c17 = arith.constant 17 : index
    %c0_14 = arith.constant 0 : index
    %c0_15 = arith.constant 0 : index
    %10 = vector.load %arg7[%c17, %c0_14, %c0_15] : memref<18x18x4xf32, #tpu.memory_space<vmem>>, vector<1x18x4xf32>
    tpu.vector_store %arg7[%c17, %c0_14, %c0_15], %9 {strides = array<i32>} : memref<18x18x4xf32, #tpu.memory_space<vmem>>, vector<1x18x4xf32>,
    %cst_16 = arith.constant 0.000000e+00 : f32
    %11 = vector.broadcast %cst_16 : f32 to vector<16x1x4xf32>
    %c1 = arith.constant 1 : index
    %c0_17 = arith.constant 0 : index
    %c0_18 = arith.constant 0 : index
    %12 = vector.load %arg7[%c1, %c0_17, %c0_18] : memref<18x18x4xf32, #tpu.memory_space<vmem>>, vector<16x1x4xf32>
    tpu.vector_store %arg7[%c1, %c0_17, %c0_18], %11 {strides = array<i32>} : memref<18x18x4xf32, #tpu.memory_space<vmem>>, vector<16x1x4xf32>,
    %cst_19 = arith.constant 0.000000e+00 : f32
    %13 = vector.broadcast %cst_19 : f32 to vector<16x1x4xf32>
    %c1_20 = arith.constant 1 : index
    %c17_21 = arith.constant 17 : index
    %c0_22 = arith.constant 0 : index
    %14 = vector.load %arg7[%c1_20, %c17_21, %c0_22] : memref<18x18x4xf32, #tpu.memory_space<vmem>>, vector<16x1x4xf32>
    tpu.vector_store %arg7[%c1_20, %c17_21, %c0_22], %13 {strides = array<i32>} : memref<18x18x4xf32, #tpu.memory_space<vmem>>, vector<16x1x4xf32>,
    %c1_23 = arith.constant 1 : index
    %c1_24 = arith.constant 1 : index
    %c0_25 = arith.constant 0 : index
    %15 = vector.load %arg7[%c1_23, %c1_24, %c0_25] : memref<18x18x4xf32, #tpu.memory_space<vmem>>, vector<16x16x4xf32>
    tpu.vector_store %arg7[%c1_23, %c1_24, %c0_25], %1 {strides = array<i32>} : memref<18x18x4xf32, #tpu.memory_space<vmem>>, vector<16x16x4xf32>,
    %cst_26 = arith.constant 0.000000e+00 : f32
    %16 = vector.broadcast %cst_26 : f32 to vector<16x16x4xf32>
    %c0_27 = arith.constant 0 : index
    %c0_28 = arith.constant 0 : index
    %c0_29 = arith.constant 0 : index
    %17 = vector.load %arg7[%c0_27, %c0_28, %c0_29] : memref<18x18x4xf32, #tpu.memory_space<vmem>>, vector<16x16x4xf32>
    %18 = vector.extract_strided_slice %2 {offsets = [0, 0, 0], sizes = [1, 1, 4], strides = [1, 1, 1]} : vector<3x3x4xf32> to vector<1x1x4xf32>
    %19 = vector.shape_cast %18 : vector<1x1x4xf32> to vector<4xf32>
    %20 = vector.shape_cast %19 : vector<4xf32> to vector<1x1x4xf32>
    %21 = vector.broadcast %20 : vector<1x1x4xf32> to vector<16x16x4xf32>
    %22 = arith.mulf %17, %21 : vector<16x16x4xf32>
    %23 = arith.addf %16, %22 : vector<16x16x4xf32>
    %c0_30 = arith.constant 0 : index
    %c1_31 = arith.constant 1 : index
    %c0_32 = arith.constant 0 : index
    %24 = vector.load %arg7[%c0_30, %c1_31, %c0_32] : memref<18x18x4xf32, #tpu.memory_space<vmem>>, vector<16x16x4xf32>
    %25 = vector.extract_strided_slice %2 {offsets = [0, 1, 0], sizes = [1, 1, 4], strides = [1, 1, 1]} : vector<3x3x4xf32> to vector<1x1x4xf32>
    %26 = vector.shape_cast %25 : vector<1x1x4xf32> to vector<4xf32>
    %27 = vector.shape_cast %26 : vector<4xf32> to vector<1x1x4xf32>
    %28 = vector.broadcast %27 : vector<1x1x4xf32> to vector<16x16x4xf32>
    %29 = arith.mulf %24, %28 : vector<16x16x4xf32>
    %30 = arith.addf %23, %29 : vector<16x16x4xf32>
    %c0_33 = arith.constant 0 : index
    %c2 = arith.constant 2 : index
    %c0_34 = arith.constant 0 : index
    %31 = vector.load %arg7[%c0_33, %c2, %c0_34] : memref<18x18x4xf32, #tpu.memory_space<vmem>>, vector<16x16x4xf32>
    %32 = vector.extract_strided_slice %2 {offsets = [0, 2, 0], sizes = [1, 1, 4], strides = [1, 1, 1]} : vector<3x3x4xf32> to vector<1x1x4xf32>
    %33 = vector.shape_cast %32 : vector<1x1x4xf32> to vector<4xf32>
    %34 = vector.shape_cast %33 : vector<4xf32> to vector<1x1x4xf32>
    %35 = vector.broadcast %34 : vector<1x1x4xf32> to vector<16x16x4xf32>
    %36 = arith.mulf %31, %35 : vector<16x16x4xf32>
    %37 = arith.addf %30, %36 : vector<16x16x4xf32>
    %c1_35 = arith.constant 1 : index
    %c0_36 = arith.constant 0 : index
    %c0_37 = arith.constant 0 : index
    %38 = vector.load %arg7[%c1_35, %c0_36, %c0_37] : memref<18x18x4xf32, #tpu.memory_space<vmem>>, vector<16x16x4xf32>
    %39 = vector.extract_strided_slice %2 {offsets = [1, 0, 0], sizes = [1, 1, 4], strides = [1, 1, 1]} : vector<3x3x4xf32> to vector<1x1x4xf32>
    %40 = vector.shape_cast %39 : vector<1x1x4xf32> to vector<4xf32>
    %41 = vector.shape_cast %40 : vector<4xf32> to vector<1x1x4xf32>
    %42 = vector.broadcast %41 : vector<1x1x4xf32> to vector<16x16x4xf32>
    %43 = arith.mulf %38, %42 : vector<16x16x4xf32>
    %44 = arith.addf %37, %43 : vector<16x16x4xf32>
    %c1_38 = arith.constant 1 : index
    %c1_39 = arith.constant 1 : index
    %c0_40 = arith.constant 0 : index
    %45 = vector.load %arg7[%c1_38, %c1_39, %c0_40] : memref<18x18x4xf32, #tpu.memory_space<vmem>>, vector<16x16x4xf32>
    %46 = vector.extract_strided_slice %2 {offsets = [1, 1, 0], sizes = [1, 1, 4], strides = [1, 1, 1]} : vector<3x3x4xf32> to vector<1x1x4xf32>
    %47 = vector.shape_cast %46 : vector<1x1x4xf32> to vector<4xf32>
    %48 = vector.shape_cast %47 : vector<4xf32> to vector<1x1x4xf32>
    %49 = vector.broadcast %48 : vector<1x1x4xf32> to vector<16x16x4xf32>
    %50 = arith.mulf %45, %49 : vector<16x16x4xf32>
    %51 = arith.addf %44, %50 : vector<16x16x4xf32>
    %c1_41 = arith.constant 1 : index
    %c2_42 = arith.constant 2 : index
    %c0_43 = arith.constant 0 : index
    %52 = vector.load %arg7[%c1_41, %c2_42, %c0_43] : memref<18x18x4xf32, #tpu.memory_space<vmem>>, vector<16x16x4xf32>
    %53 = vector.extract_strided_slice %2 {offsets = [1, 2, 0], sizes = [1, 1, 4], strides = [1, 1, 1]} : vector<3x3x4xf32> to vector<1x1x4xf32>
    %54 = vector.shape_cast %53 : vector<1x1x4xf32> to vector<4xf32>
    %55 = vector.shape_cast %54 : vector<4xf32> to vector<1x1x4xf32>
    %56 = vector.broadcast %55 : vector<1x1x4xf32> to vector<16x16x4xf32>
    %57 = arith.mulf %52, %56 : vector<16x16x4xf32>
    %58 = arith.addf %51, %57 : vector<16x16x4xf32>
    %c2_44 = arith.constant 2 : index
    %c0_45 = arith.constant 0 : index
    %c0_46 = arith.constant 0 : index
    %59 = vector.load %arg7[%c2_44, %c0_45, %c0_46] : memref<18x18x4xf32, #tpu.memory_space<vmem>>, vector<16x16x4xf32>
    %60 = vector.extract_strided_slice %2 {offsets = [2, 0, 0], sizes = [1, 1, 4], strides = [1, 1, 1]} : vector<3x3x4xf32> to vector<1x1x4xf32>
    %61 = vector.shape_cast %60 : vector<1x1x4xf32> to vector<4xf32>
    %62 = vector.shape_cast %61 : vector<4xf32> to vector<1x1x4xf32>
    %63 = vector.broadcast %62 : vector<1x1x4xf32> to vector<16x16x4xf32>
    %64 = arith.mulf %59, %63 : vector<16x16x4xf32>
    %65 = arith.addf %58, %64 : vector<16x16x4xf32>
    %c2_47 = arith.constant 2 : index
    %c1_48 = arith.constant 1 : index
    %c0_49 = arith.constant 0 : index
    %66 = vector.load %arg7[%c2_47, %c1_48, %c0_49] : memref<18x18x4xf32, #tpu.memory_space<vmem>>, vector<16x16x4xf32>
    %67 = vector.extract_strided_slice %2 {offsets = [2, 1, 0], sizes = [1, 1, 4], strides = [1, 1, 1]} : vector<3x3x4xf32> to vector<1x1x4xf32>
    %68 = vector.shape_cast %67 : vector<1x1x4xf32> to vector<4xf32>
    %69 = vector.shape_cast %68 : vector<4xf32> to vector<1x1x4xf32>
    %70 = vector.broadcast %69 : vector<1x1x4xf32> to vector<16x16x4xf32>
    %71 = arith.mulf %66, %70 : vector<16x16x4xf32>
    %72 = arith.addf %65, %71 : vector<16x16x4xf32>
    %c2_50 = arith.constant 2 : index
    %c2_51 = arith.constant 2 : index
    %c0_52 = arith.constant 0 : index
    %73 = vector.load %arg7[%c2_50, %c2_51, %c0_52] : memref<18x18x4xf32, #tpu.memory_space<vmem>>, vector<16x16x4xf32>
    %74 = vector.extract_strided_slice %2 {offsets = [2, 2, 0], sizes = [1, 1, 4], strides = [1, 1, 1]} : vector<3x3x4xf32> to vector<1x1x4xf32>
    %75 = vector.shape_cast %74 : vector<1x1x4xf32> to vector<4xf32>
    %76 = vector.shape_cast %75 : vector<4xf32> to vector<1x1x4xf32>
    %77 = vector.broadcast %76 : vector<1x1x4xf32> to vector<16x16x4xf32>
    %78 = arith.mulf %73, %77 : vector<16x16x4xf32>
    %79 = arith.addf %72, %78 : vector<16x16x4xf32>
    %80 = vector.shape_cast %4 : vector<4xf32> to vector<1x1x4xf32>
    %81 = vector.broadcast %80 : vector<1x1x4xf32> to vector<16x16x4xf32>
    %82 = arith.mulf %79, %81 : vector<16x16x4xf32>
    %83 = vector.shape_cast %6 : vector<4xf32> to vector<1x1x4xf32>
    %84 = vector.broadcast %83 : vector<1x1x4xf32> to vector<16x16x4xf32>
    %85 = arith.addf %82, %84 : vector<16x16x4xf32>
    %cst_53 = arith.constant 3.000000e+00 : f32
    %86 = vector.broadcast %cst_53 : f32 to vector<16x16x4xf32>
    %87 = arith.addf %85, %86 : vector<16x16x4xf32>
    %cst_54 = arith.constant 0.000000e+00 : f32
    %cst_55 = arith.constant 6.000000e+00 : f32
    %88 = vector.broadcast %cst_54 : f32 to vector<16x16x4xf32>
    %89 = arith.maximumf %88, %87 : vector<16x16x4xf32>
    %90 = vector.broadcast %cst_55 : f32 to vector<16x16x4xf32>
    %91 = arith.minimumf %90, %89 : vector<16x16x4xf32>
    %cst_56 = arith.constant 0.166666672 : f32
    %92 = vector.broadcast %cst_56 : f32 to vector<16x16x4xf32>
    %93 = arith.mulf %91, %92 : vector<16x16x4xf32>
    %94 = arith.mulf %85, %93 : vector<16x16x4xf32>
    %c0_57 = arith.constant 0 : index
    %c0_58 = arith.constant 0 : index
    %c0_59 = arith.constant 0 : index
    %c0_60 = arith.constant 0 : index
    %95 = vector.load %arg5[%c0_57, %c0_58, %c0_59, %c0_60] : memref<1x16x16x4xf32, #tpu.memory_space<vmem>>, vector<1x16x16x4xf32>
    %96 = vector.shape_cast %95 : vector<1x16x16x4xf32> to vector<16x16x4xf32>
    %97 = vector.shape_cast %94 : vector<16x16x4xf32> to vector<1x16x16x4xf32>
    tpu.vector_store %arg5[%c0_57, %c0_58, %c0_59, %c0_60], %97 {strides = array<i32>} : memref<1x16x16x4xf32, #tpu.memory_space<vmem>>, vector<1x16x16x4xf32>,
    %cst_61 = arith.constant dense<0.000000e+00> : vector<4xf32>
    %98 = vector.multi_reduction <add>, %94, %cst_61 [0, 1] : vector<16x16x4xf32> to vector<4xf32>
    %cst_62 = arith.constant 3.906250e-03 : f32
    %99 = vector.broadcast %cst_62 : f32 to vector<4xf32>
    %100 = arith.mulf %98, %99 : vector<4xf32>
    %101 = vector.shape_cast %100 : vector<4xf32> to vector<1x1x4xf32>
    %c0_63 = arith.constant 0 : index
    %c0_64 = arith.constant 0 : index
    %c0_65 = arith.constant 0 : index
    %102 = vector.load %arg6[%c0_63, %c0_64, %c0_65] : memref<1x1x4xf32, #tpu.memory_space<vmem>>, vector<1x1x4xf32>
    tpu.vector_store %arg6[%c0_63, %c0_64, %c0_65], %101 {strides = array<i32>} : memref<1x1x4xf32, #tpu.memory_space<vmem>>, vector<1x1x4xf32>,
    return
  }
  func.func @transform_0(%arg0: i32) -> (i32, i32, i32, i32) {
    %c0_i32 = arith.constant 0 : i32
    %c0_i32_0 = arith.constant 0 : i32
    %c0_i32_1 = arith.constant 0 : i32
    %c0_i32_2 = arith.constant 0 : i32
    return %arg0, %c0_i32, %c0_i32_0, %c0_i32_1 : i32, i32, i32, i32
  }
  func.func @transform_1(%arg0: i32) -> (i32, i32, i32) {
    %c0_i32 = arith.constant 0 : i32
    %c0_i32_0 = arith.constant 0 : i32
    %c0_i32_1 = arith.constant 0 : i32
    %c0_i32_2 = arith.constant 0 : i32
    return %c0_i32, %c0_i32_0, %c0_i32_1 : i32, i32, i32
  }
  func.func @transform_2(%arg0: i32) -> (i32, i32) {
    %c0_i32 = arith.constant 0 : i32
    %c0_i32_0 = arith.constant 0 : i32
    %c0_i32_1 = arith.constant 0 : i32
    return %c0_i32, %c0_i32_0 : i32, i32
  }
  func.func @transform_3(%arg0: i32) -> (i32, i32) {
    %c0_i32 = arith.constant 0 : i32
    %c0_i32_0 = arith.constant 0 : i32
    %c0_i32_1 = arith.constant 0 : i32
    return %c0_i32, %c0_i32_0 : i32, i32
  }
  func.func @transform_4(%arg0: i32) -> (i32, i32, i32, i32) {
    %c0_i32 = arith.constant 0 : i32
    %c0_i32_0 = arith.constant 0 : i32
    %c0_i32_1 = arith.constant 0 : i32
    %c0_i32_2 = arith.constant 0 : i32
    return %arg0, %c0_i32, %c0_i32_0, %c0_i32_1 : i32, i32, i32, i32
  }
  func.func @transform_5(%arg0: i32) -> (i32, i32, i32) {
    %c0_i32 = arith.constant 0 : i32
    %c0_i32_0 = arith.constant 0 : i32
    %c0_i32_1 = arith.constant 0 : i32
    return %arg0, %c0_i32, %c0_i32_0 : i32, i32, i32
  }
}

</mosaic_0001>

<bundles_post_ra>
// kernel: depsep_conv.3
= control target key start
LH: loop header
LB: loop body
LE: loop exit
PB: predicated region body
PF: predicated region fallthrough
CT: control target
= control target key end

     0   :  { %s1134_s18 = smov 0   ;;  %s1136_s19 = smov 0   ;;  %s1532_s0 = inlined_call_operand.vmem [shape: f32[2,16,16,4], index: 0, kind: input, shape index: {}]   ;;  %s1533_s1 = inlined_call_operand.vmem [shape: f32[2,1,4], index: 1, kind: input, shape index: {}]   ;;  %s1534_s2 = inlined_call_operand.vmem [shape: f32[4,8], index: 2, kind: input, shape index: {}]   ;;  %s1535_s3 = inlined_call_operand.vmem [shape: f32[1,8], index: 3, kind: input, shape index: {}]   ;;  %s1536_s4 = inlined_call_operand.vmem [shape: f32[1,8], index: 4, kind: input, shape index: {}]   ;;  %s1537_s5 = inlined_call_operand.vmem [shape: f32[2,16,16,8], index: 5, kind: output, shape index: {}]  }
   0x1   :  { %s1138_s20 = smov 0   ;;  %s1140_s21 = smov 0  }
   0x2   :  { %s1142_s22 = smov 0  }
   0x3 LB: > { %s24_s23 = sadd.s32 1, %s1090_s20  ;;  %s27_s24 = sadd.s32 1, %s1094_s21  ;;  %s1098_s22 = sphi %s1142_s22, %s15_s22   ;;  %s1094_s21 = sphi %s1140_s21, %s1541_s21   ;;  %s1090_s20 = sphi %s1138_s20, %s1540_s20   ;;  %s1086_s19 = sphi %s1136_s19, %s1539_s19   ;;  %s1082_s18 = sphi %s1134_s18, %s1538_s18  }
   0x4   : > { %p25_p0 = scmp.ge.s32.totalorder %s24_s23, 2  ;;  %p994_p1 = scmp.ge.s32.totalorder %s1098_s22, 1 }
   0x5   : > { %p217_p2 = scmp.lt.s32.totalorder %s1098_s22, 5 }
   0x6   : > { %s1543_s23 = smov (%p25_p0, %s24_s23), 0  ;;  %s1545_s24 = smov (!%p25_p0, %s27_s24), %s1094_s21 }
   0x7   : > { %p218_p3 = pnand %p994_p1, %p217_p2  ;;  %p29_p4 = scmp.ge.s32.totalorder %s1545_s24, 2 }
   0x8   : > { %s995_s25 = sshll.u32 (!%p218_p3), %s1082_s18, 3  ;;  %p259_p5 = scmp.lt.s32.totalorder (!%p218_p3), %s1086_s19, 1  ;;  %v1100_v0 = vmov (!%p218_p3), 0   ;;  %v1101_v34 = vmov (!%p218_p3), 1   ;;  %v1102_v35 = vmov (!%p218_p3), 2   ;;  %v1103_v36 = vmov (!%p218_p3), 3  }
   0x9   : > { %s1547_s24 = smov (%p29_p4, %s1545_s24), 0  ;;  %221 = sbr.rel (%p218_p3) target bundleno = 304 (0x130), region = 40 }
   0xa   : > { %1053 = vset.pattern.permute.xlu1 (!%p218_p3), %v1100_v0  ;;  %1052 = vset.pattern.permute.xlu0 (!%p218_p3), %v1100_v0  ;;  %p261_p6 = scmp.lt.s32.totalorder (!%p218_p3), %s995_s25, 15  ;;  %v403_v47 = vlaneseq (!%p218_p3)  ;;  %v1294_v57 = vld [vmem:[%s1534_s2] sm:$0xf] (!%p218_p3)  ;;  %vm865_vm0 = vcmask (!%p218_p3), 64512  }
   0xc   : > { %v1283_v50 = vshrl.u32 (!%p218_p3), %v403_v47, 7 }
   0xe   : > { %v505_v53 = vsub.s32 (!%p218_p3), 1, %v1283_v50  ;;  %v405_v54 = vsub.s32 (!%p218_p3), 0, %v1283_v50 }
  0x10   : > { %s1549_s19 = smov (!%p259_p5, %s1086_s19), 1  ;;  %s1551_s25 = smov (!%p261_p6, %s995_s25), 15  ;;  %v1297_v58 = vrot.slane %v1294_v57, %v505_v53  ;;  %v1300_v59 = vrot.slane %v1294_v57, %v405_v54  ;;  %v605_v54 = vsub.s32 2, %v1283_v50 }
  0x11   : > { %s997_s26 = sshll.u32 %s1549_s19, 5  ;;  %s271_s29 = scalar_lea.vmem %s1533_s1, %s1549_s19 }
  0x12   : > { %s996_s30 = sshll.u32 %s1551_s25, 1  ;;  %v1003_v1 = vld [vmem:[%s271_s29] ss:$0 sm:$0xff] }
  0x13   : > { %s1167_s6 = sadd.s32 %s997_s26, %s996_s30 }
  0x14   : > { %s998_s7 = sshll.u32 %s1167_s6, 3 }
  0x15   : > { %s1175_s10 = scalar_lea.vmem %s1532_s0, %s998_s7  ;;  %s1436_s19 = scalar_lea.vmem %s1537_s5, %s998_s7 }
  0x16   : > { %v285_v2 = vld [vmem:[%s1175_s10 + $0x10] sm:$0xff]  ;;  %v283_v3 = vld [vmem:[%s1175_s10] sm:$0xff]  ;;  %v286_v4 = vld [vmem:[%s1175_s10 + $0x18] sm:$0xff] }
  0x17   : > { %v1180_v5 = vmul.f32 %v1003_v1, %v285_v2  ;;  %v1182_v6 = vmul.f32 %v1003_v1, %v283_v3  ;;  %v284_v7 = vld [vmem:[%s1175_s10 + $0x8] sm:$0xff]  ;;  %v1187_v8 = vmul.f32 %v1003_v1, %v286_v4  ;;  %v287_v11 = vld [vmem:[%s1175_s10 + $0x20] sm:$0xff]  ;;  %v290_v14 = vld [vmem:[%s1175_s10 + $0x38] sm:$0xff] }
  0x18   : > { %v1189_v9 = vmul.f32 %v1003_v1, %v284_v7  ;;  %v288_v10 = vld [vmem:[%s1175_s10 + $0x28] sm:$0xff]  ;;  %v1197_v13 = vmul.f32 %v1003_v1, %v287_v11  ;;  %v289_v15 = vld [vmem:[%s1175_s10 + $0x30] sm:$0xff]  ;;  %v1203_v16 = vmul.f32 %v1003_v1, %v290_v14  ;;  %v291_v19 = vld [vmem:[%s1175_s10 + $0x40] sm:$0xff] }
  0x19   : > { %335 = vperm.xlu1 %1053, %v1180_v5   ;;  %325 = vperm.xlu0 %1052, %v1182_v6   ;;  %v1195_v12 = vmul.f32 %v1003_v1, %v288_v10  ;;  %v1205_v17 = vmul.f32 %v1003_v1, %v289_v15  ;;  %v292_v18 = vld [vmem:[%s1175_s10 + $0x48] sm:$0xff]  ;;  %v1213_v21 = vmul.f32 %v1003_v1, %v291_v19  ;;  %v294_v22 = vld [vmem:[%s1175_s10 + $0x58] sm:$0xff]  ;;  %v293_v23 = vld [vmem:[%s1175_s10 + $0x50] sm:$0xff] }
  0x1a   : > { %v1211_v20 = vmul.f32 %v1003_v1, %v292_v18  ;;  %v1219_v24 = vmul.f32 %v1003_v1, %v294_v22  ;;  %v1221_v25 = vmul.f32 %v1003_v1, %v293_v23  ;;  %v296_v26 = vld [vmem:[%s1175_s10 + $0x68] sm:$0xff]  ;;  %v295_v27 = vld [vmem:[%s1175_s10 + $0x60] sm:$0xff]  ;;  %v298_v30 = vld [vmem:[%s1175_s10 + $0x78] sm:$0xff] }
  0x1b   : > { %v319_v28 = vmul.f32 %v1003_v1, %v296_v26  ;;  %v1227_v29 = vmul.f32 %v1003_v1, %v295_v27  ;;  %v297_v31 = vld [vmem:[%s1175_s10 + $0x70] sm:$0xff]  ;;  %v321_v32 = vmul.f32 %v1003_v1, %v298_v30 }
  0x1c   : > { %v320_v33 = vmul.f32 %v1003_v1, %v297_v31 }
  0x1d   : > { %340 = vperm.xlu1 %1053, %v1187_v8   ;;  %330 = vperm.xlu0 %1052, %v1189_v9  }
  0x21   : > { %350 = vperm.xlu1 %1053, %v1195_v12   ;;  %345 = vperm.xlu0 %1052, %v1197_v13  }
  0x25   : > { %360 = vperm.xlu1 %1053, %v1203_v16   ;;  %355 = vperm.xlu0 %1052, %v1205_v17  }
  0x29   : > { %370 = vperm.xlu1 %1053, %v1211_v20   ;;  %365 = vperm.xlu0 %1052, %v1213_v21  }
  0x2d   : > { %380 = vperm.xlu1 %1053, %v1219_v24   ;;  %375 = vperm.xlu0 %1052, %v1221_v25  }
  0x31   : > { %390 = vperm.xlu1 %1053, %v319_v28   ;;  %385 = vperm.xlu0 %1052, %v1227_v29  }
  0x35   : > { %400 = vperm.xlu1 %1053, %v321_v32   ;;  %395 = vperm.xlu0 %1052, %v320_v33  }
  0x39   : > { %1055 = vset.pattern.permute.xlu1 %v1101_v34  ;;  %1054 = vset.pattern.permute.xlu0 %v1101_v34 }
  0x3a   : > { %444 = vperm.xlu1 %1055, %v1189_v9   ;;  %440 = vperm.xlu0 %1054, %v1182_v6  }
  0x3e   : > { %448 = vperm.xlu1 %1055, %v1180_v5   ;;  %452 = vperm.xlu0 %1054, %v1187_v8  }
  0x42   : > { %456 = vperm.xlu1 %1055, %v1197_v13   ;;  %460 = vperm.xlu0 %1054, %v1195_v12  }
  0x46   : > { %464 = vperm.xlu1 %1055, %v1205_v17   ;;  %468 = vperm.xlu0 %1054, %v1203_v16  }
  0x4a   : > { %472 = vperm.xlu1 %1055, %v1213_v21   ;;  %476 = vperm.xlu0 %1054, %v1211_v20  }
  0x4e   : > { %480 = vperm.xlu1 %1055, %v1221_v25   ;;  %484 = vperm.xlu0 %1054, %v1219_v24  }
  0x52   : > { %488 = vperm.xlu1 %1055, %v1227_v29   ;;  %492 = vperm.xlu0 %1054, %v319_v28  }
  0x56   : > { %496 = vperm.xlu1 %1055, %v320_v33   ;;  %500 = vperm.xlu0 %1054, %v321_v32  }
  0x5a   : > { %1056 = vset.pattern.permute.xlu1 %v1102_v35  ;;  %1057 = vset.pattern.permute.xlu0 %v1102_v35 }
  0x5b   : > { %540 = vperm.xlu1 %1056, %v1182_v6   ;;  %544 = vperm.xlu0 %1057, %v1189_v9  }
  0x5f   : > { %548 = vperm.xlu1 %1056, %v1180_v5   ;;  %556 = vperm.xlu0 %1057, %v1197_v13  }
  0x63   : > { %552 = vperm.xlu1 %1056, %v1187_v8   ;;  %564 = vperm.xlu0 %1057, %v1205_v17  }
  0x67   : > { %560 = vperm.xlu1 %1056, %v1195_v12   ;;  %572 = vperm.xlu0 %1057, %v1213_v21  }
  0x6b   : > { %568 = vperm.xlu1 %1056, %v1203_v16   ;;  %580 = vperm.xlu0 %1057, %v1221_v25  }
  0x6f   : > { %576 = vperm.xlu1 %1056, %v1211_v20   ;;  %588 = vperm.xlu0 %1057, %v1227_v29  }
  0x73   : > { %584 = vperm.xlu1 %1056, %v1219_v24   ;;  %596 = vperm.xlu0 %1057, %v320_v33  }
  0x77   : > { %592 = vperm.xlu1 %1056, %v319_v28   ;;  %1058 = vset.pattern.permute.xlu0 %v1103_v36 }
  0x78   : > { %640 = vperm.xlu0 %1058, %v1182_v6  }
  0x7b   : > { %600 = vperm.xlu1 %1056, %v321_v32  }
  0x7c   : > { %652 = vperm.xlu0 %1058, %v1187_v8  }
  0x7f   : > { %1059 = vset.pattern.permute.xlu1 %v1103_v36 }
  0x80   : > { %644 = vperm.xlu1 %1059, %v1189_v9   ;;  %660 = vperm.xlu0 %1058, %v1195_v12  }
  0x84   : > { %648 = vperm.xlu1 %1059, %v1180_v5   ;;  %668 = vperm.xlu0 %1058, %v1203_v16  }
  0x88   : > { %656 = vperm.xlu1 %1059, %v1197_v13   ;;  %676 = vperm.xlu0 %1058, %v1211_v20  }
  0x8c   : > { %664 = vperm.xlu1 %1059, %v1205_v17   ;;  %684 = vperm.xlu0 %1058, %v1219_v24  }
  0x90   : > { %672 = vperm.xlu1 %1059, %v1213_v21   ;;  %692 = vperm.xlu0 %1058, %v319_v28  }
  0x94   : > { %680 = vperm.xlu1 %1059, %v1221_v25   ;;  %700 = vperm.xlu0 %1058, %v321_v32  }
  0x98   : > { %v336_v37 = vpop.permute.xlu1 %335  ;;  %688 = vperm.xlu1 %1059, %v1227_v29   ;;  %v1271_v38 = vpop.permute.xlu0 %325 }
  0x99   : > { %v409_v3 = vmul.f32 %v1300_v59, %v336_v37 }
  0x9c   : > { %v1273_v39 = vpop.permute.xlu1 %340  ;;  %696 = vperm.xlu1 %1059, %v320_v33   ;;  %v331_v40 = vpop.permute.xlu0 %330 }
  0x9d   : > { %v408_v62 = vmul.f32 %v1300_v59, %v331_v40 }
  0xa0   : > { %v1275_v41 = vpop.permute.xlu1 %350  ;;  %v346_v42 = vpop.permute.xlu0 %345 }
  0xa1   : > { %v411_v8 = vmul.f32 %v1300_v59, %v346_v42 }
  0xa4   : > { %v1277_v43 = vpop.permute.xlu1 %360  ;;  %v356_v44 = vpop.permute.xlu0 %355 }
  0xa5   : > { %v413_v13 = vmul.f32 %v1300_v59, %v356_v44 }
  0xa8   : > { %v1279_v45 = vpop.permute.xlu1 %370  ;;  %v366_v46 = vpop.permute.xlu0 %365 }
  0xa9   : > { %v415_v18 = vmul.f32 %v1300_v59, %v366_v46 }
  0xac   : > { %v1281_v48 = vpop.permute.xlu1 %380  ;;  %v376_v49 = vpop.permute.xlu0 %375 }
  0xad   : > { %v417_v23 = vmul.f32 %v1300_v59, %v376_v49 }
  0xb0   : > { %v1285_v51 = vpop.permute.xlu1 %390  ;;  %v386_v52 = vpop.permute.xlu0 %385 }
  0xb1   : > { %v419_v28 = vmul.f32 %v1300_v59, %v386_v52 }
  0xb4   : > { %v1289_v55 = vpop.permute.xlu1 %400  ;;  %v396_v56 = vpop.permute.xlu0 %395 }
  0xb5   : > { %v421_v33 = vmul.f32 %v1300_v59, %v396_v56  ;;  %v1336_v56 = vrot.slane %v1294_v57, %v605_v54 }
  0xb9   : > { %v445_v60 = vpop.permute.xlu1 %444  ;;  %v441_v61 = vpop.permute.xlu0 %440 }
  0xba   : > { %v508_v63 = vmul.f32 %v1297_v58, %v445_v60 }
  0xbc   : > { %v1304_v0 = vadd.f32 %v508_v63, %v408_v62  ;;  %v705_v63 = vsub.s32 3, %v1283_v50  ;;  %v412_v50 = vmul.f32 %v1300_v59, %v1275_v41  ;;  %v420_v41 = vmul.f32 %v1300_v59, %v1285_v51  ;;  %v1376_v51 = vld [vmem:[%s1535_s3] ss:$0 sm:$0xff] }
  0xbd   : > { %v449_v1 = vpop.permute.xlu1 %448  ;;  %v453_v2 = vpop.permute.xlu0 %452 }
  0xbe   : > { %v509_v4 = vmul.f32 %v1297_v58, %v449_v1  ;;  %v507_v1 = vmul.f32 %v1297_v58, %v441_v61  ;;  %v510_v61 = vmul.f32 %v1297_v58, %v453_v2 }
  0xc0   : > { %v1308_v5 = vadd.f32 %v509_v4, %v409_v3 }
  0xc1   : > { %v457_v6 = vpop.permute.xlu1 %456  ;;  %v461_v7 = vpop.permute.xlu0 %460 }
  0xc2   : > { %v511_v9 = vmul.f32 %v1297_v58, %v457_v6  ;;  %v407_v6 = vmul.f32 %v1300_v59, %v1271_v38  ;;  %v414_v38 = vmul.f32 %v1300_v59, %v1277_v43 }
  0xc4   : > { %v1312_v10 = vadd.f32 %v511_v9, %v411_v8  ;;  %v410_v8 = vmul.f32 %v1300_v59, %v1273_v39  ;;  %v416_v39 = vmul.f32 %v1300_v59, %v1279_v45 }
  0xc5   : > { %v465_v11 = vpop.permute.xlu1 %464  ;;  %v469_v12 = vpop.permute.xlu0 %468 }
  0xc6   : > { %v513_v14 = vmul.f32 %v1297_v58, %v465_v11  ;;  %v1350_v11 = vrot.slane %v1294_v57, %v705_v63 }
  0xc8   : > { %v1316_v15 = vadd.f32 %v513_v14, %v413_v13  ;;  %v512_v13 = vmul.f32 %v1297_v58, %v461_v7  ;;  %v514_v14 = vmul.f32 %v1297_v58, %v469_v12 }
  0xc9   : > { %v473_v16 = vpop.permute.xlu1 %472  ;;  %v477_v17 = vpop.permute.xlu0 %476 }
  0xca   : > { %v515_v19 = vmul.f32 %v1297_v58, %v473_v16  ;;  %v523_v16 = vadd.f32 %v507_v1, %v407_v6 }
  0xcc   : > { %v1320_v20 = vadd.f32 %v515_v19, %v415_v18  ;;  %v516_v18 = vmul.f32 %v1297_v58, %v477_v17  ;;  %v418_v19 = vmul.f32 %v1300_v59, %v1281_v48  ;;  %v422_v17 = vmul.f32 %v1300_v59, %v1289_v55  ;;  %v1385_v59 = vld [vmem:[%s1536_s4] ss:$0 sm:$0xff] }
  0xcd   : > { %v481_v21 = vpop.permute.xlu1 %480  ;;  %v485_v22 = vpop.permute.xlu0 %484  ;;  %v528_v48 = vadd.f32 %v512_v13, %v412_v50 }
  0xce   : > { %v517_v24 = vmul.f32 %v1297_v58, %v481_v21  ;;  %v518_v2 = vmul.f32 %v1297_v58, %v485_v22  ;;  %v532_v22 = vadd.f32 %v516_v18, %v416_v39 }
  0xd0   : > { %v1324_v25 = vadd.f32 %v517_v24, %v417_v23  ;;  %v526_v24 = vadd.f32 %v510_v61, %v410_v8 }
  0xd1   : > { %v489_v26 = vpop.permute.xlu1 %488  ;;  %v493_v27 = vpop.permute.xlu0 %492 }
  0xd2   : > { %v519_v29 = vmul.f32 %v1297_v58, %v489_v26  ;;  %v520_v7 = vmul.f32 %v1297_v58, %v493_v27  ;;  %v530_v26 = vadd.f32 %v514_v14, %v414_v38 }
  0xd4   : > { %v1328_v30 = vadd.f32 %v519_v29, %v419_v28 }
  0xd5   : > { %v497_v31 = vpop.permute.xlu1 %496  ;;  %v501_v32 = vpop.permute.xlu0 %500 }
  0xd6   : > { %v521_v34 = vmul.f32 %v1297_v58, %v497_v31  ;;  %v522_v43 = vmul.f32 %v1297_v58, %v501_v32  ;;  %v534_v31 = vadd.f32 %v518_v2, %v418_v19  ;;  %v536_v32 = vadd.f32 %v520_v7, %v420_v41 }
  0xd8   : > { %v1332_v35 = vadd.f32 %v521_v34, %v421_v33 }
  0xda   : > { %v541_v36 = vpop.permute.xlu1 %540  ;;  %v545_v37 = vpop.permute.xlu0 %544 }
  0xdb   : > { %v607_v9 = vmul.f32 %v1336_v56, %v541_v36  ;;  %v608_v27 = vmul.f32 %v1336_v56, %v545_v37  ;;  %v1387_v36 = vadd.f32 %v522_v43, %v422_v17 }
  0xdd   : > { %v623_v21 = vadd.f32 %v607_v9, %v523_v16  ;;  %v624_v1 = vadd.f32 %v608_v27, %v1304_v0 }
  0xde   : > { %v549_v40 = vpop.permute.xlu1 %548  ;;  %v557_v42 = vpop.permute.xlu0 %556 }
  0xdf   : > { %v609_v58 = vmul.f32 %v1336_v56, %v549_v40  ;;  %v611_v33 = vmul.f32 %v1336_v56, %v557_v42 }
  0xe1   : > { %v625_v6 = vadd.f32 %v609_v58, %v1308_v5  ;;  %v627_v50 = vadd.f32 %v611_v33, %v1312_v10 }
  0xe2   : > { %v553_v44 = vpop.permute.xlu1 %552  ;;  %v565_v46 = vpop.permute.xlu0 %564 }
  0xe3   : > { %v610_v45 = vmul.f32 %v1336_v56, %v553_v44  ;;  %v613_v54 = vmul.f32 %v1336_v56, %v565_v46 }
  0xe5   : > { %v626_v44 = vadd.f32 %v610_v45, %v526_v24  ;;  %v1405_v38 = vadd.f32 %v613_v54, %v1316_v15 }
  0xe6   : > { %v561_v47 = vpop.permute.xlu1 %560  ;;  %v573_v49 = vpop.permute.xlu0 %572 }
  0xe7   : > { %v612_v55 = vmul.f32 %v1336_v56, %v561_v47  ;;  %v615_v63 = vmul.f32 %v1336_v56, %v573_v49 }
  0xe9   : > { %v628_v61 = vadd.f32 %v612_v55, %v528_v48  ;;  %v1408_v10 = vadd.f32 %v615_v63, %v1320_v20 }
  0xea   : > { %v569_v52 = vpop.permute.xlu1 %568  ;;  %v581_v53 = vpop.permute.xlu0 %580 }
  0xeb   : > { %v614_v42 = vmul.f32 %v1336_v56, %v569_v52  ;;  %v617_v47 = vmul.f32 %v1336_v56, %v581_v53 }
  0xed   : > { %v630_v39 = vadd.f32 %v614_v42, %v530_v26 }
  0xee   : > { %v577_v60 = vpop.permute.xlu1 %576  ;;  %v589_v62 = vpop.permute.xlu0 %588 }
  0xef   : > { %v616_v13 = vmul.f32 %v1336_v56, %v577_v60  ;;  %v619_v46 = vmul.f32 %v1336_v56, %v589_v62  ;;  %v1411_v60 = vadd.f32 %v617_v47, %v1324_v25 }
  0xf1   : > { %v632_v41 = vadd.f32 %v616_v13, %v532_v22  ;;  %v1415_v2 = vadd.f32 %v619_v46, %v1328_v30 }
  0xf2   : > { %v1340_v3 = vpop.permute.xlu1 %584  ;;  %v1342_v4 = vpop.permute.xlu0 %596 }
  0xf3   : > { %v618_v15 = vmul.f32 %v1336_v56, %v1340_v3 }
  0xf6   : > { %v593_v57 = vpop.permute.xlu1 %592 }
  0xf7   : > { %v641_v12 = vpop.permute.xlu0 %640  ;;  %v620_v20 = vmul.f32 %v1336_v56, %v593_v57 }
  0xf8   : > { %v707_v23 = vmul.f32 %v1350_v11, %v641_v12 }
  0xf9   : > { %v1438_v22 = vadd.f32 %v620_v20, %v536_v32 }
  0xfa   : > { %v723_v28 = vadd.f32 %v707_v23, %v623_v21  ;;  %v601_v29 = vpop.permute.xlu1 %600  ;;  %v1424_v23 = vmul.f32 %v1336_v56, %v1342_v4  ;;  %v634_v4 = vadd.f32 %v618_v15, %v534_v31 }
  0xfb   : > { %v653_v34 = vpop.permute.xlu0 %652  ;;  %v622_v30 = vmul.f32 %v1336_v56, %v601_v29 }
  0xfc   : > { %v746_v37 = vmul.f32 %v1376_v51, %v723_v28  ;;  %v710_v40 = vmul.f32 %v1350_v11, %v653_v34 }
  0xfd   : > { %v1447_v31 = vadd.f32 %v622_v30, %v1387_v36 }
  0xfe   : > { %v769_v8 = vadd.f32 %v1385_v59, %v746_v37  ;;  %v726_v9 = vadd.f32 %v710_v40, %v626_v44 }
  0xff   : > { %v645_v49 = vpop.permute.xlu1 %644  ;;  %v661_v14 = vpop.permute.xlu0 %660 }
 0x100   : > { %v785_v52 = vadd.f32 3.0, %v769_v8  ;;  %v749_v53 = vmul.f32 %v1376_v51, %v726_v9  ;;  %v708_v0 = vmul.f32 %v1350_v11, %v645_v49  ;;  %v712_v5 = vmul.f32 %v1350_v11, %v661_v14 }
 0x102   : > { %v801_v62 = vmax.f32 %v785_v52, 0.0  ;;  %v772_v16 = vadd.f32 %v1385_v59, %v749_v53  ;;  %v724_v18 = vadd.f32 %v708_v0, %v624_v1  ;;  %v728_v19 = vadd.f32 %v712_v5, %v628_v61 }
 0x103   : > { %v649_v7 = vpop.permute.xlu1 %648  ;;  %v669_v12 = vpop.permute.xlu0 %668 }
 0x104   : > { %v817_v43 = vmin.f32 %v801_v62, 6.0  ;;  %v788_v25 = vadd.f32 3.0, %v772_v16  ;;  %v747_v21 = vmul.f32 %v1376_v51, %v724_v18  ;;  %v751_v45 = vmul.f32 %v1376_v51, %v728_v19 }
 0x105   : > { %v709_v17 = vmul.f32 %v1350_v11, %v649_v7  ;;  %v714_v3 = vmul.f32 %v1350_v11, %v669_v12 }
 0x106   : > { %v833_v24 = vmul.f32 0.16666667, %v817_v43  ;;  %v804_v57 = vmax.f32 %v788_v25, 0.0  ;;  %v770_v48 = vadd.f32 %v1385_v59, %v747_v21  ;;  %v774_v26 = vadd.f32 %v1385_v59, %v751_v45 }
 0x107   : > { %v725_v56 = vadd.f32 %v709_v17, %v625_v6  ;;  %v730_v27 = vadd.f32 %v714_v3, %v630_v39  ;;  %v657_v58 = vpop.permute.xlu1 %656  ;;  %v677_v28 = vpop.permute.xlu0 %676 }
 0x108   : > { %v849_v29 = vmul.f32 %v833_v24, %v769_v8  ;;  %v820_v33 = vmin.f32 %v804_v57, 6.0  ;;  %v786_v55 = vadd.f32 3.0, %v770_v48  ;;  %v790_v34 = vadd.f32 3.0, %v774_v26 }
 0x109   : > { %v748_v44 = vmul.f32 %v1376_v51, %v725_v56  ;;  %v753_v37 = vmul.f32 %v1376_v51, %v730_v27  ;;  %v711_v40 = vmul.f32 %v1350_v11, %v657_v58  ;;  %v716_v54 = vmul.f32 %v1350_v11, %v677_v28 }
 0x10a   : > { %866 = vst.msk [vmem:[%s1436_s19] sm:$0xff] %vm865_vm0, %v849_v29  ;;  %v836_v32 = vmul.f32 0.16666667, %v820_v33  ;;  %v802_v63 = vmax.f32 %v786_v55, 0.0  ;;  %v806_v42 = vmax.f32 %v790_v34, 0.0 }
 0x10b   : > { %v771_v47 = vadd.f32 %v1385_v59, %v748_v44  ;;  %v776_v1 = vadd.f32 %v1385_v59, %v753_v37  ;;  %v727_v6 = vadd.f32 %v711_v40, %v627_v50  ;;  %v732_v8 = vadd.f32 %v716_v54, %v632_v41  ;;  %v665_v9 = vpop.permute.xlu1 %664  ;;  %v685_v61 = vpop.permute.xlu0 %684 }
 0x10c   : > { %v852_v13 = vmul.f32 %v836_v32, %v772_v16  ;;  %v818_v46 = vmin.f32 %v802_v63, 6.0  ;;  %v822_v49 = vmin.f32 %v806_v42, 6.0  ;;  %v713_v14 = vmul.f32 %v1350_v11, %v665_v9 }
 0x10d   : > { %v787_v52 = vadd.f32 3.0, %v771_v47  ;;  %v792_v36 = vadd.f32 3.0, %v776_v1  ;;  %v750_v53 = vmul.f32 %v1376_v51, %v727_v6  ;;  %v755_v0 = vmul.f32 %v1376_v51, %v732_v8 }
 0x10e   : > { %869 = vst.msk [vmem:[%s1436_s19 + $0x18] sm:$0xff] %vm865_vm0, %v852_v13  ;;  %v834_v5 = vmul.f32 0.16666667, %v818_v46  ;;  %v838_v39 = vmul.f32 0.16666667, %v822_v49  ;;  %v729_v50 = vadd.f32 %v713_v14, %v1405_v38  ;;  %v718_v62 = vmul.f32 %v1350_v11, %v685_v61 }
 0x10f   : > { %v803_v16 = vmax.f32 %v787_v52, 0.0  ;;  %v808_v18 = vmax.f32 %v792_v36, 0.0  ;;  %v773_v19 = vadd.f32 %v1385_v59, %v750_v53  ;;  %v778_v41 = vadd.f32 %v1385_v59, %v755_v0  ;;  %v673_v15 = vpop.permute.xlu1 %672  ;;  %v693_v20 = vpop.permute.xlu0 %692 }
 0x110   : > { %v850_v7 = vmul.f32 %v834_v5, %v770_v48  ;;  %v854_v12 = vmul.f32 %v838_v39, %v774_v26  ;;  %v752_v43 = vmul.f32 %v1376_v51, %v729_v50  ;;  %v734_v25 = vadd.f32 %v718_v62, %v634_v4 }
 0x111   : > { %v819_v21 = vmin.f32 %v803_v16, 6.0  ;;  %v824_v45 = vmin.f32 %v808_v18, 6.0  ;;  %v789_v38 = vadd.f32 3.0, %v773_v19  ;;  %v794_v30 = vadd.f32 3.0, %v778_v41 }
 0x112   : > { %867 = vst.msk [vmem:[%s1436_s19 + $0x8] sm:$0xff] %vm865_vm0, %v850_v7  ;;  %871 = vst.msk [vmem:[%s1436_s19 + $0x28] sm:$0xff] %vm865_vm0, %v854_v12  ;;  %v775_v17 = vadd.f32 %v1385_v59, %v752_v43  ;;  %v757_v3 = vmul.f32 %v1376_v51, %v734_v25  ;;  %v715_v24 = vmul.f32 %v1350_v11, %v673_v15 }
 0x113   : > { %v720_v57 = vmul.f32 %v1350_v11, %v693_v20  ;;  %v835_v48 = vmul.f32 0.16666667, %v819_v21  ;;  %v840_v26 = vmul.f32 0.16666667, %v824_v45  ;;  %v805_v56 = vmax.f32 %v789_v38, 0.0  ;;  %v681_v27 = vpop.permute.xlu1 %680  ;;  %v701_v55 = vpop.permute.xlu0 %700 }
 0x114   : > { %v810_v4 = vmax.f32 %v794_v30, 0.0  ;;  %v791_v58 = vadd.f32 3.0, %v775_v17  ;;  %v780_v28 = vadd.f32 %v1385_v59, %v757_v3  ;;  %v731_v29 = vadd.f32 %v715_v24, %v1408_v10 }
 0x115   : > { %v736_v33 = vadd.f32 %v720_v57, %v1438_v22  ;;  %v851_v34 = vmul.f32 %v835_v48, %v771_v47  ;;  %v856_v44 = vmul.f32 %v840_v26, %v776_v1  ;;  %v821_v37 = vmin.f32 %v805_v56, 6.0 }
 0x116   : > { %v826_v40 = vmin.f32 %v810_v4, 6.0  ;;  %v807_v54 = vmax.f32 %v791_v58, 0.0  ;;  %v796_v32 = vadd.f32 3.0, %v780_v28  ;;  %v754_v63 = vmul.f32 %v1376_v51, %v731_v29 }
 0x117   : > { %v759_v42 = vmul.f32 %v1376_v51, %v736_v33  ;;  %868 = vst.msk [vmem:[%s1436_s19 + $0x10] sm:$0xff] %vm865_vm0, %v851_v34  ;;  %873 = vst.msk [vmem:[%s1436_s19 + $0x38] sm:$0xff] %vm865_vm0, %v856_v44  ;;  %v837_v6 = vmul.f32 0.16666667, %v821_v37  ;;  %v717_v10 = vmul.f32 %v1350_v11, %v681_v27  ;;  %v722_v22 = vmul.f32 %v1350_v11, %v701_v55  ;;  %v689_v47 = vpop.permute.xlu1 %688 }
 0x118   : > { %v842_v8 = vmul.f32 0.16666667, %v826_v40  ;;  %v823_v1 = vmin.f32 %v807_v54, 6.0  ;;  %v812_v9 = vmax.f32 %v796_v32, 0.0  ;;  %v777_v61 = vadd.f32 %v1385_v59, %v754_v63 }
 0x119   : > { %v782_v13 = vadd.f32 %v1385_v59, %v759_v42  ;;  %v853_v46 = vmul.f32 %v837_v6, %v773_v19  ;;  %v733_v14 = vadd.f32 %v717_v10, %v1411_v60  ;;  %v738_v52 = vadd.f32 %v722_v22, %v1447_v31 }
 0x11a   : > { %v858_v49 = vmul.f32 %v842_v8, %v778_v41  ;;  %v839_v36 = vmul.f32 0.16666667, %v823_v1  ;;  %v828_v53 = vmin.f32 %v812_v9, 6.0  ;;  %v793_v0 = vadd.f32 3.0, %v777_v61 }
 0x11b   : > { %v798_v5 = vadd.f32 3.0, %v782_v13  ;;  %v637_v39 = vadd.f32 %v1424_v23, %v1332_v35  ;;  %870 = vst.msk [vmem:[%s1436_s19 + $0x20] sm:$0xff] %vm865_vm0, %v853_v46  ;;  %v756_v50 = vmul.f32 %v1376_v51, %v733_v14  ;;  %v761_v62 = vmul.f32 %v1376_v51, %v738_v52  ;;  %v697_v16 = vpop.permute.xlu1 %696 }
 0x11c   : > { %875 = vst.msk [vmem:[%s1436_s19 + $0x48] sm:$0xff] %vm865_vm0, %v858_v49  ;;  %v719_v60 = vmul.f32 %v1350_v11, %v689_v47  ;;  %v855_v31 = vmul.f32 %v839_v36, %v775_v17  ;;  %v844_v18 = vmul.f32 0.16666667, %v828_v53  ;;  %v809_v19 = vmax.f32 %v793_v0, 0.0 }
 0x11d   : > { %v814_v41 = vmax.f32 %v798_v5, 0.0  ;;  %v779_v15 = vadd.f32 %v1385_v59, %v756_v50  ;;  %v784_v35 = vadd.f32 %v1385_v59, %v761_v62  ;;  %v721_v20 = vmul.f32 %v1350_v11, %v697_v16 }
 0x11e   : > { %v735_v23 = vadd.f32 %v719_v60, %v1415_v2  ;;  %872 = vst.msk [vmem:[%s1436_s19 + $0x30] sm:$0xff] %vm865_vm0, %v855_v31  ;;  %v860_v7 = vmul.f32 %v844_v18, %v780_v28  ;;  %v825_v12 = vmin.f32 %v809_v19, 6.0 }
 0x11f   : > { %v830_v43 = vmin.f32 %v814_v41, 6.0  ;;  %v795_v25 = vadd.f32 3.0, %v779_v15  ;;  %v800_v21 = vadd.f32 3.0, %v784_v35  ;;  %v737_v38 = vadd.f32 %v721_v20, %v637_v39 }
 0x120   : > { %v758_v45 = vmul.f32 %v1376_v51, %v735_v23  ;;  %877 = vst.msk [vmem:[%s1436_s19 + $0x58] sm:$0xff] %vm865_vm0, %v860_v7  ;;  %v841_v30 = vmul.f32 0.16666667, %v825_v12 }
 0x121   : > { %v846_v17 = vmul.f32 0.16666667, %v830_v43  ;;  %v811_v3 = vmax.f32 %v795_v25, 0.0  ;;  %v816_v2 = vmax.f32 %v800_v21, 0.0  ;;  %v760_v24 = vmul.f32 %v1376_v51, %v737_v38 }
 0x122   : > { %v781_v11 = vadd.f32 %v1385_v59, %v758_v45  ;;  %v857_v57 = vmul.f32 %v841_v30, %v777_v61 }
 0x123   : > { %v862_v48 = vmul.f32 %v846_v17, %v782_v13  ;;  %v827_v26 = vmin.f32 %v811_v3, 6.0  ;;  %v832_v56 = vmin.f32 %v816_v2, 6.0  ;;  %v783_v27 = vadd.f32 %v1385_v59, %v760_v24 }
 0x124   : > { %v797_v4 = vadd.f32 3.0, %v781_v11  ;;  %874 = vst.msk [vmem:[%s1436_s19 + $0x40] sm:$0xff] %vm865_vm0, %v857_v57 }
 0x125   : > { %879 = vst.msk [vmem:[%s1436_s19 + $0x68] sm:$0xff] %vm865_vm0, %v862_v48  ;;  %v843_v58 = vmul.f32 0.16666667, %v827_v26  ;;  %v848_v28 = vmul.f32 0.16666667, %v832_v56  ;;  %v799_v33 = vadd.f32 3.0, %v783_v27 }
 0x126   : > { %v813_v29 = vmax.f32 %v797_v4, 0.0 }
 0x127   : > { %v859_v51 = vmul.f32 %v843_v58, %v779_v15  ;;  %v864_v55 = vmul.f32 %v848_v28, %v784_v35  ;;  %v815_v44 = vmax.f32 %v799_v33, 0.0 }
 0x128   : > { %v829_v34 = vmin.f32 %v813_v29, 6.0 }
 0x129   : > { %876 = vst.msk [vmem:[%s1436_s19 + $0x50] sm:$0xff] %vm865_vm0, %v859_v51  ;;  %881 = vst.msk [vmem:[%s1436_s19 + $0x78] sm:$0xff] %vm865_vm0, %v864_v55  ;;  %v831_v59 = vmin.f32 %v815_v44, 6.0 }
 0x12a   : > { %v845_v37 = vmul.f32 0.16666667, %v829_v34 }
 0x12b   : > { %v847_v54 = vmul.f32 0.16666667, %v831_v59 }
 0x12c   : > { %v861_v40 = vmul.f32 %v845_v37, %v781_v11 }
 0x12d   : > { %v863_v32 = vmul.f32 %v847_v54, %v783_v27 }
 0x12e   : > { %878 = vst.msk [vmem:[%s1436_s19 + $0x60] sm:$0xff] %vm865_vm0, %v861_v40 }
 0x12f   : > { %880 = vst.msk [vmem:[%s1436_s19 + $0x70] sm:$0xff] %vm865_vm0, %v863_v32 }
 0x130 PF: > { %s15_s22 = sadd.s32 1, %s1098_s22   ;;  %s1538_s18 = smov %s1090_s20 }
 0x131   : > { %p12_p7 = scmp.ge.s32.totalorder %s15_s22, 6   ;;  %s1539_s19 = smov %s1094_s21 }
 0x132   : > { %s1540_s20 = smov %s1543_s23  ;;  %s1541_s21 = smov %s1547_s24 }
 0x133   :  { %14 = sbr.rel (!%p12_p7) target bundleno = 3 (0x3), region = 73 }

// kernel: depsep_conv.2
= control target key start
LH: loop header
LB: loop body
LE: loop exit
PB: predicated region body
PF: predicated region fallthrough
CT: control target
= control target key end

     0   :  { %s1731_s18 = smov 0   ;;  %s2843_s0 = inlined_call_operand.vmem [shape: f32[2,16,16,4], index: 0, kind: input, shape index: {}]   ;;  %s2844_s1 = inlined_call_operand.vmem [shape: f32[3,3,4], index: 1, kind: input, shape index: {}]   ;;  %s2845_s2 = inlined_call_operand.vmem [shape: f32[1,4], index: 2, kind: input, shape index: {}]   ;;  %s2846_s3 = inlined_call_operand.vmem [shape: f32[1,4], index: 3, kind: input, shape index: {}]   ;;  %s2847_s4 = inlined_call_operand.vmem [shape: f32[2,16,16,4], index: 4, kind: output, shape index: {0}]   ;;  %s2848_s5 = inlined_call_operand.vmem [shape: f32[2,1,4], index: 5, kind: output, shape index: {1}]  }
   0x1 LB: > { %s1666_s19 = sadd.s32 4294967295, %s1698_s18   ;;  %p1670_p0 = scmp.ge.s32.totalorder %s1698_s18, 1  ;;  %s1698_s18 = sphi %s1731_s18, %s16_s18  }
   0x2   : > { %p190_p1 = scmp.lt.s32.totalorder %s1698_s18, 3 }
   0x4   : > { %p191_p2 = pnand %p1670_p0, %p190_p1 }
   0x5   : > { %vm271_vm0 = vcmask (!%p191_p2), 31744   ;;  %vm274_vm1 = vcmask (!%p191_p2), 25600   ;;  %vm281_vm2 = vcmask (!%p191_p2), 24576   ;;  %p1741_p3 = scmp.lt.s32.totalorder (!%p191_p2), %s1666_s19, 1  ;;  %v1700_v0 = vmov (!%p191_p2), 0.0  }
   0x6   : > { %194 = sbr.rel (%p191_p2) target bundleno = 272 (0x110), region = 36  ;;  %272 = vst.msk [vmem:[#allocation2] sm:$0xff] (!%p191_p2), %vm271_vm0, %v1700_v0  ;;  %273 = vst.msk [vmem:[#allocation2 + $0x8] sm:$0xff] (!%p191_p2), %vm271_vm0, %v1700_v0  ;;  %v378_v1 = vlaneseq (!%p191_p2)  ;;  %v266_v6 = vld [vmem:[%s2844_s1] sm:$0x7] (!%p191_p2) }
   0x7   : > { %277 = vst.msk [vmem:[#allocation2 + $0x198] sm:$0xff] (!%p191_p2), %vm271_vm0, %v1700_v0  ;;  %278 = vst.msk [vmem:[#allocation2 + $0x1a0] sm:$0xff] (!%p191_p2), %vm271_vm0, %v1700_v0  ;;  %v267_v10 = vld [vmem:[%s2844_s1 + $0x4] sm:$0x7] (!%p191_p2)  ;;  %v268_v15 = vld [vmem:[%s2844_s1 + $0x8] sm:$0x7] (!%p191_p2) }
   0x8   : > { %275 = vst.msk [vmem:[#allocation2 + $0x10] sm:$0x3] (!%p191_p2), %vm274_vm1, %v1700_v0  ;;  %279 = vst.msk [vmem:[#allocation2 + $0x1a8] sm:$0x3] (!%p191_p2), %vm274_vm1, %v1700_v0  ;;  %v379_v2 = vshrl.u32 (!%p191_p2), %v378_v1, 7 }
   0x9   : > { %282 = vst.msk [vmem:[#allocation2 + $0x18] sm:$0x1] (!%p191_p2), %vm281_vm2, %v1700_v0  ;;  %283 = vst.msk [vmem:[#allocation2 + $0x30] sm:$0x1] (!%p191_p2), %vm281_vm2, %v1700_v0 }
   0xa   : > { %284 = vst.msk [vmem:[#allocation2 + $0x48] sm:$0x1] (!%p191_p2), %vm281_vm2, %v1700_v0  ;;  %285 = vst.msk [vmem:[#allocation2 + $0x60] sm:$0x1] (!%p191_p2), %vm281_vm2, %v1700_v0  ;;  %v380_v11 = vsub.s32 (!%p191_p2), 0, %v379_v2  ;;  %v480_v16 = vsub.s32 (!%p191_p2), 1, %v379_v2 }
   0xb   : > { %286 = vst.msk [vmem:[#allocation2 + $0x78] sm:$0x1] (!%p191_p2), %vm281_vm2, %v1700_v0  ;;  %287 = vst.msk [vmem:[#allocation2 + $0x90] sm:$0x1] (!%p191_p2), %vm281_vm2, %v1700_v0  ;;  %v580_v17 = vsub.s32 (!%p191_p2), 2, %v379_v2 }
   0xc   : > { %288 = vst.msk [vmem:[#allocation2 + $0xa8] sm:$0x1] (!%p191_p2), %vm281_vm2, %v1700_v0  ;;  %289 = vst.msk [vmem:[#allocation2 + $0xc0] sm:$0x1] (!%p191_p2), %vm281_vm2, %v1700_v0  ;;  %v1837_v27 = vrot.slane (!%p191_p2), %v266_v6, %v380_v11  ;;  %v1845_v31 = vrot.slane (!%p191_p2), %v266_v6, %v480_v16  ;;  %v1849_v33 = vrot.slane (!%p191_p2), %v267_v10, %v380_v11 }
   0xd   : > { %290 = vst.msk [vmem:[#allocation2 + $0xd8] sm:$0x1] %vm281_vm2, %v1700_v0  ;;  %291 = vst.msk [vmem:[#allocation2 + $0xf0] sm:$0x1] %vm281_vm2, %v1700_v0  ;;  %s2851_s19 = smov (!%p1741_p3, %s1666_s19), 1  ;;  %v1847_v32 = vrot.slane %v266_v6, %v580_v17  ;;  %v1857_v37 = vrot.slane %v267_v10, %v480_v16  ;;  %v1859_v38 = vrot.slane %v267_v10, %v580_v17  ;;  %v346_v42 = vld [vmem:[#allocation2] sm:$0xff] }
   0xe   : > { %292 = vst.msk [vmem:[#allocation2 + $0x108] sm:$0x1] %vm281_vm2, %v1700_v0  ;;  %293 = vst.msk [vmem:[#allocation2 + $0x120] sm:$0x1] %vm281_vm2, %v1700_v0  ;;  %s1679_s21 = sshll.u32 %s2851_s19, 8  ;;  %v1861_v39 = vrot.slane %v268_v15, %v380_v11  ;;  %v1868_v43 = vrot.slane %v268_v15, %v480_v16  ;;  %v1870_v44 = vrot.slane %v268_v15, %v580_v17  ;;  %v446_v46 = vld [vmem:[#allocation2 + $0x1] sm:$0xff] }
   0xf   : > { %294 = vst.msk [vmem:[#allocation2 + $0x138] sm:$0x1] %vm281_vm2, %v1700_v0  ;;  %295 = vst.msk [vmem:[#allocation2 + $0x150] sm:$0x1] %vm281_vm2, %v1700_v0  ;;  %s1793_s24 = scalar_lea.vmem %s2843_s0, %s1679_s21  ;;  %v382_v45 = vmul.f32 %v1837_v27, %v346_v42  ;;  %v546_v47 = vld [vmem:[#allocation2 + $0x2] sm:$0xff]  ;;  %v482_v49 = vmul.f32 %v1845_v31, %v446_v46  ;;  %s2056_s12 = scalar_lea.vmem %s2847_s4, %s1679_s21 }
  0x10   : > { %296 = vst.msk [vmem:[#allocation2 + $0x168] sm:$0x1] %vm281_vm2, %v1700_v0  ;;  %297 = vst.msk [vmem:[#allocation2 + $0x180] sm:$0x1] %vm281_vm2, %v1700_v0  ;;  %v234_v3 = vld [vmem:[%s1793_s24] sm:$0xff]  ;;  %v235_v4 = vld [vmem:[%s1793_s24 + $0x8] sm:$0xff]  ;;  %v582_v50 = vmul.f32 %v1847_v32, %v546_v47  ;;  %s233_s21 = scalar_lea.vmem %s2848_s5, %s2851_s19 }
  0x11   : > { %298 = vst.msk [vmem:[#allocation2 + $0x29] sm:$0x1] %vm281_vm2, %v1700_v0  ;;  %299 = vst.msk [vmem:[#allocation2 + $0x41] sm:$0x1] %vm281_vm2, %v1700_v0  ;;  %v236_v5 = vld [vmem:[%s1793_s24 + $0x10] sm:$0xff]  ;;  %v237_v7 = vld [vmem:[%s1793_s24 + $0x18] sm:$0xff]  ;;  %v514_v63 = vadd.f32 %v482_v49, %v382_v45 }
  0x12   : > { %300 = vst.msk [vmem:[#allocation2 + $0x59] sm:$0x1] %vm281_vm2, %v1700_v0  ;;  %301 = vst.msk [vmem:[#allocation2 + $0x71] sm:$0x1] %vm281_vm2, %v1700_v0  ;;  %v238_v8 = vld [vmem:[%s1793_s24 + $0x20] sm:$0xff]  ;;  %v239_v9 = vld [vmem:[%s1793_s24 + $0x28] sm:$0xff] }
  0x13   : > { %302 = vst.msk [vmem:[#allocation2 + $0x89] sm:$0x1] %vm281_vm2, %v1700_v0  ;;  %303 = vst.msk [vmem:[#allocation2 + $0xa1] sm:$0x1] %vm281_vm2, %v1700_v0  ;;  %v240_v12 = vld [vmem:[%s1793_s24 + $0x30] sm:$0xff]  ;;  %v241_v13 = vld [vmem:[%s1793_s24 + $0x38] sm:$0xff] }
  0x14   : > { %304 = vst.msk [vmem:[#allocation2 + $0xb9] sm:$0x1] %vm281_vm2, %v1700_v0  ;;  %305 = vst.msk [vmem:[#allocation2 + $0xd1] sm:$0x1] %vm281_vm2, %v1700_v0  ;;  %v242_v14 = vld [vmem:[%s1793_s24 + $0x40] sm:$0xff]  ;;  %v243_v18 = vld [vmem:[%s1793_s24 + $0x48] sm:$0xff] }
  0x15   : > { %306 = vst.msk [vmem:[#allocation2 + $0xe9] sm:$0x1] %vm281_vm2, %v1700_v0  ;;  %307 = vst.msk [vmem:[#allocation2 + $0x101] sm:$0x1] %vm281_vm2, %v1700_v0  ;;  %v244_v19 = vld [vmem:[%s1793_s24 + $0x50] sm:$0xff]  ;;  %v245_v20 = vld [vmem:[%s1793_s24 + $0x58] sm:$0xff] }
  0x16   : > { %308 = vst.msk [vmem:[#allocation2 + $0x119] sm:$0x1] %vm281_vm2, %v1700_v0  ;;  %309 = vst.msk [vmem:[#allocation2 + $0x131] sm:$0x1] %vm281_vm2, %v1700_v0  ;;  %v246_v21 = vld [vmem:[%s1793_s24 + $0x60] sm:$0xff]  ;;  %v247_v22 = vld [vmem:[%s1793_s24 + $0x68] sm:$0xff] }
  0x17   : > { %310 = vst.msk [vmem:[#allocation2 + $0x149] sm:$0x1] %vm281_vm2, %v1700_v0  ;;  %311 = vst.msk [vmem:[#allocation2 + $0x161] sm:$0x1] %vm281_vm2, %v1700_v0  ;;  %v248_v23 = vld [vmem:[%s1793_s24 + $0x70] sm:$0xff]  ;;  %v249_v24 = vld [vmem:[%s1793_s24 + $0x78] sm:$0xff] }
  0x18   : > { %312 = vst.msk [vmem:[#allocation2 + $0x179] sm:$0x1] %vm281_vm2, %v1700_v0  ;;  %313 = vst.msk [vmem:[#allocation2 + $0x191] sm:$0x1] %vm281_vm2, %v1700_v0  ;;  %v250_v25 = vld [vmem:[%s1793_s24 + $0x80] sm:$0xff]  ;;  %v251_v26 = vld [vmem:[%s1793_s24 + $0x88] sm:$0xff] }
  0x19   : > { %314 = vst.msk [vmem:[#allocation2 + $0x19] sm:$0xff] %vm271_vm0, %v234_v3  ;;  %315 = vst.msk [vmem:[#allocation2 + $0x21] sm:$0xff] %vm271_vm0, %v235_v4  ;;  %v252_v28 = vld [vmem:[%s1793_s24 + $0x90] sm:$0xff]  ;;  %v253_v29 = vld [vmem:[%s1793_s24 + $0x98] sm:$0xff] }
  0x1a   : > { %316 = vst.msk [vmem:[#allocation2 + $0x31] sm:$0xff] %vm271_vm0, %v236_v5  ;;  %317 = vst.msk [vmem:[#allocation2 + $0x39] sm:$0xff] %vm271_vm0, %v237_v7  ;;  %v254_v30 = vld [vmem:[%s1793_s24 + $0xa0] sm:$0xff]  ;;  %v255_v34 = vld [vmem:[%s1793_s24 + $0xa8] sm:$0xff] }
  0x1b   : > { %318 = vst.msk [vmem:[#allocation2 + $0x49] sm:$0xff] %vm271_vm0, %v238_v8  ;;  %319 = vst.msk [vmem:[#allocation2 + $0x51] sm:$0xff] %vm271_vm0, %v239_v9  ;;  %v256_v35 = vld [vmem:[%s1793_s24 + $0xb0] sm:$0xff]  ;;  %v257_v36 = vld [vmem:[%s1793_s24 + $0xb8] sm:$0xff] }
  0x1c   : > { %320 = vst.msk [vmem:[#allocation2 + $0x61] sm:$0xff] %vm271_vm0, %v240_v12  ;;  %321 = vst.msk [vmem:[#allocation2 + $0x69] sm:$0xff] %vm271_vm0, %v241_v13  ;;  %v258_v40 = vld [vmem:[%s1793_s24 + $0xc0] sm:$0xff]  ;;  %v259_v41 = vld [vmem:[%s1793_s24 + $0xc8] sm:$0xff]  ;;  %v614_v13 = vadd.f32 %v582_v50, %v514_v63 }
  0x1d   : > { %322 = vst.msk [vmem:[#allocation2 + $0x79] sm:$0xff] %vm271_vm0, %v242_v14  ;;  %323 = vst.msk [vmem:[#allocation2 + $0x81] sm:$0xff] %vm271_vm0, %v243_v18  ;;  %v347_v61 = vld [vmem:[#allocation2 + $0x8] sm:$0xff] }
  0x1e   : > { %324 = vst.msk [vmem:[#allocation2 + $0x91] sm:$0xff] %vm271_vm0, %v244_v19  ;;  %325 = vst.msk [vmem:[#allocation2 + $0x99] sm:$0xff] %vm271_vm0, %v245_v20  ;;  %v383_v2 = vmul.f32 %v1837_v27, %v347_v61  ;;  %v447_v3 = vld [vmem:[#allocation2 + $0x9] sm:$0xff] }
  0x1f   : > { %326 = vst.msk [vmem:[#allocation2 + $0xa9] sm:$0xff] %vm271_vm0, %v246_v21  ;;  %327 = vst.msk [vmem:[#allocation2 + $0xb1] sm:$0xff] %vm271_vm0, %v247_v22  ;;  %v547_v4 = vld [vmem:[#allocation2 + $0xa] sm:$0xff]  ;;  %v483_v6 = vmul.f32 %v1845_v31, %v447_v3 }
  0x20   : > { %328 = vst.msk [vmem:[#allocation2 + $0xc1] sm:$0xff] %vm271_vm0, %v248_v23  ;;  %329 = vst.msk [vmem:[#allocation2 + $0xc9] sm:$0xff] %vm271_vm0, %v249_v24  ;;  %v646_v48 = vld [vmem:[#allocation2 + $0x18] sm:$0xff]  ;;  %v647_v5 = vld [vmem:[#allocation2 + $0x20] sm:$0xff]  ;;  %v583_v7 = vmul.f32 %v1847_v32, %v547_v4 }
  0x21   : > { %330 = vst.msk [vmem:[#allocation2 + $0xd9] sm:$0xff] %vm271_vm0, %v250_v25  ;;  %331 = vst.msk [vmem:[#allocation2 + $0xe1] sm:$0xff] %vm271_vm0, %v251_v26  ;;  %v682_v51 = vmul.f32 %v1849_v33, %v646_v48  ;;  %v746_v52 = vld [vmem:[#allocation2 + $0x19] sm:$0xff]  ;;  %v1878_v54 = vld [vmem:[#allocation2 + $0x30] sm:$0xff]  ;;  %v384_v55 = vmul.f32 %v646_v48, %v1837_v27  ;;  %v683_v8 = vmul.f32 %v1849_v33, %v647_v5 }
  0x22   : > { %332 = vst.msk [vmem:[#allocation2 + $0xf1] sm:$0xff] %vm271_vm0, %v252_v28  ;;  %333 = vst.msk [vmem:[#allocation2 + $0xf9] sm:$0xff] %vm271_vm0, %v253_v29  ;;  %v846_v53 = vld [vmem:[#allocation2 + $0x1a] sm:$0xff]  ;;  %v782_v56 = vmul.f32 %v1857_v37, %v746_v52  ;;  %v1885_v58 = vmul.f32 %v1861_v39, %v1878_v54  ;;  %v1887_v59 = vld [vmem:[#allocation2 + $0x31] sm:$0xff]  ;;  %v484_v62 = vmul.f32 %v746_v52, %v1845_v31 }
  0x23   : > { %334 = vst.msk [vmem:[#allocation2 + $0x109] sm:$0xff] %vm271_vm0, %v254_v30  ;;  %335 = vst.msk [vmem:[#allocation2 + $0x111] sm:$0xff] %vm271_vm0, %v255_v34  ;;  %v882_v57 = vmul.f32 %v1859_v38, %v846_v53  ;;  %v1889_v60 = vld [vmem:[#allocation2 + $0x32] sm:$0xff]  ;;  %v1894_v0 = vmul.f32 %v1868_v43, %v1887_v59  ;;  %v747_v9 = vld [vmem:[#allocation2 + $0x21] sm:$0xff]  ;;  %v515_v20 = vadd.f32 %v483_v6, %v383_v2 }
  0x24   : > { %336 = vst.msk [vmem:[#allocation2 + $0x121] sm:$0xff] %vm271_vm0, %v256_v35  ;;  %337 = vst.msk [vmem:[#allocation2 + $0x129] sm:$0xff] %vm271_vm0, %v257_v36  ;;  %v1898_v1 = vmul.f32 %v1870_v44, %v1889_v60  ;;  %v847_v10 = vld [vmem:[#allocation2 + $0x22] sm:$0xff]  ;;  %v1904_v11 = vld [vmem:[#allocation2 + $0x38] sm:$0xff]  ;;  %v516_v12 = vadd.f32 %v484_v62, %v384_v55  ;;  %v783_v14 = vmul.f32 %v1857_v37, %v747_v9 }
  0x25   : > { %338 = vst.msk [vmem:[#allocation2 + $0x139] sm:$0xff] %vm271_vm0, %v258_v40  ;;  %339 = vst.msk [vmem:[#allocation2 + $0x141] sm:$0xff] %vm271_vm0, %v259_v41  ;;  %v883_v15 = vmul.f32 %v1859_v38, %v847_v10  ;;  %v984_v16 = vmul.f32 %v1861_v39, %v1904_v11  ;;  %v1910_v17 = vld [vmem:[#allocation2 + $0x39] sm:$0xff]  ;;  %v260_v19 = vld [vmem:[%s1793_s24 + $0xd0] sm:$0xff]  ;;  %v584_v24 = vmul.f32 %v846_v53, %v1847_v32 }
  0x26   : > { %v1912_v18 = vld [vmem:[#allocation2 + $0x3a] sm:$0xff]  ;;  %v1917_v21 = vmul.f32 %v1868_v43, %v1910_v17  ;;  %340 = vst.msk [vmem:[#allocation2 + $0x151] sm:$0xff] %vm271_vm0, %v260_v19  ;;  %v714_v25 = vadd.f32 %v682_v51, %v614_v13  ;;  %v684_v26 = vmul.f32 %v1878_v54, %v1849_v33  ;;  %v784_v28 = vmul.f32 %v1887_v59, %v1857_v37  ;;  %v1933_v30 = vld [vmem:[#allocation2 + $0x48] sm:$0xff]  ;;  %v1954_v62 = vld [vmem:[#allocation2 + $0x50] sm:$0xff] }
  0x27   : > { %v1921_v22 = vmul.f32 %v1870_v44, %v1912_v18  ;;  %v261_v23 = vld [vmem:[%s1793_s24 + $0xd8] sm:$0xff]  ;;  %v884_v29 = vmul.f32 %v1889_v60, %v1859_v38  ;;  %v1935_v34 = vld [vmem:[#allocation2 + $0x49] sm:$0xff]  ;;  %v615_v35 = vadd.f32 %v583_v7, %v515_v20  ;;  %v616_v36 = vadd.f32 %v584_v24, %v516_v12  ;;  %v262_v19 = vld [vmem:[%s1793_s24 + $0xe0] sm:$0xff] }
  0x28   : > { %341 = vst.msk [vmem:[#allocation2 + $0x159] sm:$0xff] %vm271_vm0, %v261_v23  ;;  %v985_v40 = vmul.f32 %v1861_v39, %v1933_v30  ;;  %v1085_v41 = vmul.f32 %v1868_v43, %v1935_v34  ;;  %v1941_v42 = vld [vmem:[#allocation2 + $0x4a] sm:$0xff]  ;;  %v814_v45 = vadd.f32 %v782_v56, %v714_v25  ;;  %v385_v47 = vmul.f32 %v647_v5, %v1837_v27  ;;  %v1962_v5 = vld [vmem:[#allocation2 + $0x52] sm:$0xff] }
  0x29   : > { %v1185_v46 = vmul.f32 %v1870_v44, %v1941_v42  ;;  %v485_v48 = vmul.f32 %v747_v9, %v1845_v31  ;;  %v715_v49 = vadd.f32 %v683_v8, %v615_v35  ;;  %v716_v50 = vadd.f32 %v684_v26, %v616_v36  ;;  %v1956_v63 = vld [vmem:[#allocation2 + $0x51] sm:$0xff]  ;;  %342 = vst.msk [vmem:[#allocation2 + $0x169] sm:$0xff] %vm271_vm0, %v262_v19  ;;  %v1988_v26 = vld [vmem:[#allocation2 + $0x60] sm:$0xff] }
  0x2a   : > { %v585_v51 = vmul.f32 %v847_v10, %v1847_v32  ;;  %v685_v52 = vmul.f32 %v1904_v11, %v1849_v33  ;;  %v914_v53 = vadd.f32 %v882_v57, %v814_v45  ;;  %v785_v61 = vmul.f32 %v1910_v17, %v1857_v37  ;;  %v2003_v45 = vld [vmem:[%s2846_s3] ss:$0 sm:$0xff] }
  0x2b   : > { %v517_v55 = vadd.f32 %v485_v48, %v385_v47  ;;  %v885_v56 = vmul.f32 %v1912_v18, %v1859_v38  ;;  %v815_v2 = vadd.f32 %v783_v14, %v715_v49  ;;  %v816_v3 = vadd.f32 %v784_v28, %v716_v50  ;;  %v1990_v28 = vld [vmem:[#allocation2 + $0x61] sm:$0xff]  ;;  %v264_v50 = vld [vmem:[%s1793_s24 + $0xf0] sm:$0xff] }
  0x2c   : > { %v986_v4 = vmul.f32 %v1861_v39, %v1954_v62  ;;  %v1086_v57 = vmul.f32 %v1868_v43, %v1956_v63  ;;  %v1015_v6 = vadd.f32 %v1885_v58, %v914_v53  ;;  %v1186_v8 = vmul.f32 %v1870_v44, %v1962_v5  ;;  %344 = vst.msk [vmem:[#allocation2 + $0x181] sm:$0xff] %vm271_vm0, %v264_v50 }
  0x2d   : > { %v617_v7 = vadd.f32 %v585_v51, %v517_v55  ;;  %v386_v9 = vmul.f32 %v1878_v54, %v1837_v27  ;;  %v915_v10 = vadd.f32 %v883_v15, %v815_v2  ;;  %v916_v12 = vadd.f32 %v884_v29, %v816_v3  ;;  %v263_v54 = vld [vmem:[%s1793_s24 + $0xe8] sm:$0xff] }
  0x2e   : > { %v486_v13 = vmul.f32 %v1887_v59, %v1845_v31  ;;  %v586_v14 = vmul.f32 %v1889_v60, %v1847_v32  ;;  %v1115_v20 = vadd.f32 %v1894_v0, %v1015_v6  ;;  %v686_v58 = vmul.f32 %v1933_v30, %v1849_v33  ;;  %v1984_v59 = vld [vmem:[%s2845_s2] ss:$0 sm:$0xff]  ;;  %343 = vst.msk [vmem:[#allocation2 + $0x171] sm:$0xff] %vm271_vm0, %v263_v54 }
  0x2f   : > { %v717_v23 = vadd.f32 %v685_v52, %v617_v7  ;;  %v786_v24 = vmul.f32 %v1935_v34, %v1857_v37  ;;  %v1016_v15 = vadd.f32 %v984_v16, %v915_v10  ;;  %v1017_v60 = vadd.f32 %v985_v40, %v916_v12  ;;  %v1998_v40 = vld [vmem:[#allocation2 + $0x62] sm:$0xff] }
  0x30   : > { %v518_v25 = vadd.f32 %v486_v13, %v386_v9  ;;  %v886_v0 = vmul.f32 %v1941_v42, %v1859_v38  ;;  %v1215_v29 = vadd.f32 %v1898_v1, %v1115_v20  ;;  %v987_v36 = vmul.f32 %v1861_v39, %v1988_v26 }
  0x31   : > { %v817_v35 = vadd.f32 %v785_v61, %v717_v23  ;;  %v1087_v16 = vmul.f32 %v1868_v43, %v1990_v28  ;;  %v1116_v47 = vadd.f32 %v1917_v21, %v1016_v15  ;;  %v1117_v48 = vadd.f32 %v1085_v41, %v1017_v60  ;;  %v265_v61 = vld [vmem:[%s1793_s24 + $0xf8] sm:$0xff]  ;;  %v2039_v60 = vld [vmem:[#allocation2 + $0x6a] sm:$0xff] }
  0x32   : > { %v618_v49 = vadd.f32 %v586_v14, %v518_v25  ;;  %v1187_v1 = vmul.f32 %v1870_v44, %v1998_v40  ;;  %v1253_v51 = vmul.f32 %v1984_v59, %v1215_v29  ;;  %v387_v53 = vmul.f32 %v1904_v11, %v1837_v27  ;;  %345 = vst.msk [vmem:[#allocation2 + $0x189] sm:$0xff] %vm271_vm0, %v265_v61  ;;  %v2029_v14 = vld [vmem:[#allocation2 + $0x68] sm:$0xff] }
  0x33   : > { %v917_v52 = vadd.f32 %v885_v56, %v817_v35  ;;  %v487_v55 = vmul.f32 %v1910_v17, %v1845_v31  ;;  %v1216_v21 = vadd.f32 %v1921_v22, %v1116_v47  ;;  %v1217_v41 = vadd.f32 %v1185_v46, %v1117_v48 }
  0x34   : > { %v718_v2 = vadd.f32 %v686_v58, %v618_v49  ;;  %v587_v3 = vmul.f32 %v1912_v18, %v1847_v32  ;;  %v1291_v56 = vadd.f32 %v2003_v45, %v1253_v51  ;;  %v687_v11 = vmul.f32 %v1954_v62, %v1849_v33  ;;  %v2035_v58 = vld [vmem:[#allocation2 + $0x69] sm:$0xff] }
  0x35   : > { %v1018_v6 = vadd.f32 %v986_v4, %v917_v52  ;;  %v519_v7 = vadd.f32 %v487_v55, %v387_v53  ;;  %v1254_v17 = vmul.f32 %v1984_v59, %v1216_v21  ;;  %v1255_v9 = vmul.f32 %v1984_v59, %v1217_v41 }
  0x36   : > { %v818_v10 = vadd.f32 %v786_v24, %v718_v2  ;;  %v787_v22 = vmul.f32 %v1956_v63, %v1857_v37  ;;  %v1323_v46 = vadd.f32 3.0, %v1291_v56  ;;  %v887_v13 = vmul.f32 %v1962_v5, %v1859_v38 }
  0x37   : > { %v1118_v12 = vadd.f32 %v1086_v57, %v1018_v6  ;;  %v619_v18 = vadd.f32 %v587_v3, %v519_v7  ;;  %v1292_v4 = vadd.f32 %v2003_v45, %v1254_v17  ;;  %v1293_v19 = vadd.f32 %v2003_v45, %v1255_v9 }
  0x38   : > { %v918_v20 = vadd.f32 %v886_v0, %v818_v10  ;;  %v988_v23 = vmul.f32 %v1861_v39, %v2029_v14  ;;  %v1355_v24 = vmax.f32 %v1323_v46, 0.0  ;;  %v1088_v57 = vmul.f32 %v1868_v43, %v2035_v58 }
  0x39   : > { %v1218_v54 = vadd.f32 %v1186_v8, %v1118_v12  ;;  %v719_v15 = vadd.f32 %v687_v11, %v619_v18  ;;  %v1324_v25 = vadd.f32 3.0, %v1292_v4  ;;  %v1325_v29 = vadd.f32 3.0, %v1293_v19 }
  0x3a   : > { %v1019_v35 = vadd.f32 %v987_v36, %v918_v20  ;;  %v1188_v0 = vmul.f32 %v1870_v44, %v2039_v60  ;;  %v1387_v47 = vmin.f32 %v1355_v24, 6.0  ;;  %v388_v8 = vmul.f32 %v1933_v30, %v1837_v27  ;;  %v2067_v20 = vld [vmem:[#allocation2 + $0x78] sm:$0xff] }
  0x3b   : > { %v1256_v48 = vmul.f32 %v1984_v59, %v1218_v54  ;;  %v819_v49 = vadd.f32 %v787_v22, %v719_v15  ;;  %v1356_v50 = vmax.f32 %v1324_v25, 0.0  ;;  %v1357_v51 = vmax.f32 %v1325_v29, 0.0 }
  0x3c   : > { %v1119_v52 = vadd.f32 %v1087_v16, %v1019_v35  ;;  %v488_v53 = vmul.f32 %v1935_v34, %v1845_v31  ;;  %v1419_v55 = vmul.f32 0.16666667, %v1387_v47  ;;  %v588_v21 = vmul.f32 %v1941_v42, %v1847_v32  ;;  %v2080_v47 = vld [vmem:[#allocation2 + $0x79] sm:$0xff] }
  0x3d   : > { %v1294_v61 = vadd.f32 %v2003_v45, %v1256_v48  ;;  %v919_v36 = vadd.f32 %v887_v13, %v819_v49  ;;  %v1388_v30 = vmin.f32 %v1356_v50, 6.0  ;;  %v1389_v41 = vmin.f32 %v1357_v51, 6.0 }
  0x3e   : > { %v1219_v16 = vadd.f32 %v1187_v1, %v1119_v52  ;;  %v520_v2 = vadd.f32 %v488_v53, %v388_v8  ;;  %v1451_v3 = vmul.f32 %v1419_v55, %v1291_v56  ;;  %v688_v7 = vmul.f32 %v1988_v26, %v1849_v33  ;;  %v2087_v55 = vld [vmem:[#allocation2 + $0x7a] sm:$0xff] }
  0x3f   : > { %v1326_v34 = vadd.f32 3.0, %v1294_v61  ;;  %v1020_v6 = vadd.f32 %v988_v23, %v919_v36  ;;  %v1420_v11 = vmul.f32 0.16666667, %v1388_v30  ;;  %v1421_v17 = vmul.f32 0.16666667, %v1389_v41 }
  0x40   : > { %v1257_v42 = vmul.f32 %v1984_v59, %v1219_v16  ;;  %v620_v9 = vadd.f32 %v588_v21, %v520_v2  ;;  %1483 = vst.msk [vmem:[%s2056_s12] sm:$0xff] %vm271_vm0, %v1451_v3  ;;  %v1515_v10 = vsel %vm271_vm0, %v1451_v3, 0.0  ;;  %v788_v56 = vmul.f32 %v1990_v28, %v1857_v37 }
  0x41   : > { %v1358_v22 = vmax.f32 %v1326_v34, 0.0  ;;  %v1120_v1 = vadd.f32 %v1088_v57, %v1020_v6  ;;  %v1452_v46 = vmul.f32 %v1420_v11, %v1292_v4  ;;  %v1453_v12 = vmul.f32 %v1421_v17, %v1293_v19  ;;  %v2102_v11 = vld [vmem:[#allocation2 + $0x80] sm:$0xff] }
  0x42   : > { %v1295_v18 = vadd.f32 %v2003_v45, %v1257_v42  ;;  %v720_v13 = vadd.f32 %v688_v7, %v620_v9  ;;  %v888_v54 = vmul.f32 %v1998_v40, %v1859_v38  ;;  %v989_v15 = vmul.f32 %v1861_v39, %v2067_v20 }
  0x43   : > { %v1390_v23 = vmin.f32 %v1358_v22, 6.0  ;;  %v1220_v24 = vadd.f32 %v1188_v0, %v1120_v1  ;;  %1484 = vst.msk [vmem:[%s2056_s12 + $0x8] sm:$0xff] %vm271_vm0, %v1452_v46  ;;  %v1516_v57 = vsel %vm271_vm0, %v1452_v46, 0.0  ;;  %1485 = vst.msk [vmem:[%s2056_s12 + $0x10] sm:$0xff] %vm271_vm0, %v1453_v12  ;;  %v1518_v4 = vsel %vm271_vm0, %v1453_v12, 0.0 }
  0x44   : > { %v1327_v19 = vadd.f32 3.0, %v1295_v18  ;;  %v820_v25 = vadd.f32 %v788_v56, %v720_v13  ;;  %v1517_v29 = vadd.f32 %v1516_v57, %v1515_v10  ;;  %v1089_v8 = vmul.f32 %v1868_v43, %v2080_v47  ;;  %v2108_v10 = vld [vmem:[#allocation2 + $0x81] sm:$0xff] }
  0x45   : > { %v1422_v35 = vmul.f32 0.16666667, %v1390_v23  ;;  %v1258_v0 = vmul.f32 %v1984_v59, %v1220_v24  ;;  %v389_v50 = vmul.f32 %v1954_v62, %v1837_v27  ;;  %v489_v36 = vmul.f32 %v1956_v63, %v1845_v31  ;;  %v2114_v23 = vld [vmem:[#allocation2 + $0x82] sm:$0xff] }
  0x46   : > { %v1359_v48 = vmax.f32 %v1327_v19, 0.0  ;;  %v920_v49 = vadd.f32 %v888_v54, %v820_v25  ;;  %v1519_v51 = vadd.f32 %v1518_v4, %v1517_v29  ;;  %v1189_v41 = vmul.f32 %v1870_v44, %v2087_v55 }
  0x47   : > { %v1454_v52 = vmul.f32 %v1422_v35, %v1294_v61  ;;  %v1296_v53 = vadd.f32 %v2003_v45, %v1258_v0  ;;  %v589_v16 = vmul.f32 %v1962_v5, %v1847_v32  ;;  %v521_v2 = vadd.f32 %v489_v36, %v389_v50 }
  0x48   : > { %v1391_v21 = vmin.f32 %v1359_v48, 6.0  ;;  %v1021_v30 = vadd.f32 %v989_v15, %v920_v49  ;;  %v689_v3 = vmul.f32 %v2029_v14, %v1849_v33  ;;  %v789_v7 = vmul.f32 %v2035_v58, %v1857_v37  ;;  %v2137_v49 = vld [vmem:[#allocation2 + $0x91] sm:$0xff] }
  0x49   : > { %1486 = vst.msk [vmem:[%s2056_s12 + $0x18] sm:$0xff] %vm271_vm0, %v1454_v52  ;;  %v1520_v62 = vsel %vm271_vm0, %v1454_v52, 0.0  ;;  %v1328_v61 = vadd.f32 3.0, %v1296_v53  ;;  %v621_v5 = vadd.f32 %v589_v16, %v521_v2  ;;  %v889_v42 = vmul.f32 %v2039_v60, %v1859_v38 }
  0x4a   : > { %v1521_v34 = vadd.f32 %v1520_v62, %v1519_v51  ;;  %v1423_v6 = vmul.f32 0.16666667, %v1391_v21  ;;  %v1121_v63 = vadd.f32 %v1089_v8, %v1021_v30  ;;  %v990_v9 = vmul.f32 %v1861_v39, %v2102_v11  ;;  %v2141_v21 = vld [vmem:[#allocation2 + $0x92] sm:$0xff] }
  0x4b   : > { %v1360_v17 = vmax.f32 %v1328_v61, 0.0  ;;  %v1090_v56 = vmul.f32 %v1868_v43, %v2108_v10  ;;  %v390_v46 = vmul.f32 %v1988_v26, %v1837_v27  ;;  %v721_v13 = vadd.f32 %v689_v3, %v621_v5  ;;  %v2162_v5 = vld [vmem:[#allocation2 + $0x99] sm:$0xff] }
  0x4c   : > { %v1455_v22 = vmul.f32 %v1423_v6, %v1295_v18  ;;  %v1221_v1 = vadd.f32 %v1189_v41, %v1121_v63  ;;  %v490_v24 = vmul.f32 %v1990_v28, %v1845_v31  ;;  %v590_v54 = vmul.f32 %v1998_v40, %v1847_v32  ;;  %v2128_v28 = vld [vmem:[#allocation2 + $0x90] sm:$0xff] }
  0x4d   : > { %v1392_v12 = vmin.f32 %v1360_v17, 6.0  ;;  %v1190_v57 = vmul.f32 %v1870_v44, %v2114_v23  ;;  %v690_v26 = vmul.f32 %v2067_v20, %v1849_v33  ;;  %v821_v25 = vadd.f32 %v789_v7, %v721_v13  ;;  %v2160_v17 = vld [vmem:[#allocation2 + $0x98] sm:$0xff] }
  0x4e   : > { %1487 = vst.msk [vmem:[%s2056_s12 + $0x20] sm:$0xff] %vm271_vm0, %v1455_v22  ;;  %v1522_v18 = vsel %vm271_vm0, %v1455_v22, 0.0  ;;  %v1259_v15 = vmul.f32 %v1984_v59, %v1221_v1  ;;  %v522_v29 = vadd.f32 %v490_v24, %v390_v46  ;;  %v790_v35 = vmul.f32 %v2080_v47, %v1857_v37 }
  0x4f   : > { %v1523_v4 = vadd.f32 %v1522_v18, %v1521_v34  ;;  %v1424_v19 = vmul.f32 0.16666667, %v1392_v12  ;;  %v890_v0 = vmul.f32 %v2087_v55, %v1859_v38  ;;  %v991_v48 = vmul.f32 %v1861_v39, %v2128_v28  ;;  %v2168_v12 = vld [vmem:[#allocation2 + $0x9a] sm:$0xff] }
  0x50   : > { %v1297_v40 = vadd.f32 %v2003_v45, %v1259_v15  ;;  %v921_v50 = vadd.f32 %v889_v42, %v821_v25  ;;  %v622_v51 = vadd.f32 %v590_v54, %v522_v29  ;;  %v1091_v52 = vmul.f32 %v1868_v43, %v2137_v49 }
  0x51   : > { %v1456_v8 = vmul.f32 %v1424_v19, %v1296_v53  ;;  %v391_v30 = vmul.f32 %v2029_v14, %v1837_v27  ;;  %v491_v41 = vmul.f32 %v2035_v58, %v1845_v31  ;;  %v591_v16 = vmul.f32 %v2039_v60, %v1847_v32 }
  0x52   : > { %v1329_v36 = vadd.f32 3.0, %v1297_v40  ;;  %v1022_v62 = vadd.f32 %v990_v9, %v921_v50  ;;  %v722_v61 = vadd.f32 %v690_v26, %v622_v51  ;;  %v1191_v2 = vmul.f32 %v1870_v44, %v2141_v21  ;;  %v2190_v51 = vld [vmem:[#allocation2 + $0xa9] sm:$0xff] }
  0x53   : > { %1488 = vst.msk [vmem:[%s2056_s12 + $0x28] sm:$0xff] %vm271_vm0, %v1456_v8  ;;  %v1524_v53 = vsel %vm271_vm0, %v1456_v8, 0.0  ;;  %v523_v6 = vadd.f32 %v491_v41, %v391_v30  ;;  %v691_v14 = vmul.f32 %v2102_v11, %v1849_v33  ;;  %v791_v60 = vmul.f32 %v2108_v10, %v1857_v37 }
  0x54   : > { %v1525_v3 = vadd.f32 %v1524_v53, %v1523_v4  ;;  %v1361_v34 = vmax.f32 %v1329_v36, 0.0  ;;  %v1122_v63 = vadd.f32 %v1090_v56, %v1022_v62  ;;  %v822_v58 = vadd.f32 %v790_v35, %v722_v61  ;;  %v2199_v61 = vld [vmem:[#allocation2 + $0xaa] sm:$0xff] }
  0x55   : > { %v891_v7 = vmul.f32 %v2114_v23, %v1859_v38  ;;  %v623_v9 = vadd.f32 %v591_v16, %v523_v6  ;;  %v992_v22 = vmul.f32 %v1861_v39, %v2160_v17  ;;  %v1092_v1 = vmul.f32 %v1868_v43, %v2162_v5 }
  0x56   : > { %v1393_v42 = vmin.f32 %v1361_v34, 6.0  ;;  %v1222_v56 = vadd.f32 %v1190_v57, %v1122_v63  ;;  %v922_v46 = vadd.f32 %v890_v0, %v822_v58  ;;  %v392_v13 = vmul.f32 %v2067_v20, %v1837_v27  ;;  %v2185_v0 = vld [vmem:[#allocation2 + $0xa8] sm:$0xff] }
  0x57   : > { %v492_v24 = vmul.f32 %v2080_v47, %v1845_v31  ;;  %v723_v18 = vadd.f32 %v691_v14, %v623_v9  ;;  %v1192_v15 = vmul.f32 %v1870_v44, %v2168_v12  ;;  %v592_v26 = vmul.f32 %v2087_v55, %v1847_v32 }
  0x58   : > { %v1425_v54 = vmul.f32 0.16666667, %v1393_v42  ;;  %v1260_v57 = vmul.f32 %v1984_v59, %v1222_v56  ;;  %v1023_v4 = vadd.f32 %v991_v48, %v922_v46  ;;  %v692_v25 = vmul.f32 %v2128_v28, %v1849_v33 }
  0x59   : > { %v524_v19 = vadd.f32 %v492_v24, %v392_v13  ;;  %v823_v29 = vadd.f32 %v791_v60, %v723_v18  ;;  %v792_v47 = vmul.f32 %v2137_v49, %v1857_v37  ;;  %v892_v35 = vmul.f32 %v2141_v21, %v1859_v38  ;;  %v2219_v13 = vld [vmem:[#allocation2 + $0xb1] sm:$0xff] }
  0x5a   : > { %v1457_v20 = vmul.f32 %v1425_v54, %v1297_v40  ;;  %v1298_v8 = vadd.f32 %v2003_v45, %v1260_v57  ;;  %v1123_v55 = vadd.f32 %v1091_v52, %v1023_v4  ;;  %v993_v48 = vmul.f32 %v1861_v39, %v2185_v0 }
  0x5b   : > { %v624_v50 = vadd.f32 %v592_v26, %v524_v19  ;;  %v923_v36 = vadd.f32 %v891_v7, %v823_v29  ;;  %v1093_v30 = vmul.f32 %v1868_v43, %v2190_v51  ;;  %v393_v41 = vmul.f32 %v2102_v11, %v1837_v27 }
  0x5c   : > { %1489 = vst.msk [vmem:[%s2056_s12 + $0x30] sm:$0xff] %vm271_vm0, %v1457_v20  ;;  %v1526_v40 = vsel %vm271_vm0, %v1457_v20, 0.0  ;;  %v1330_v53 = vadd.f32 3.0, %v1298_v8  ;;  %v1223_v52 = vadd.f32 %v1191_v2, %v1123_v55  ;;  %v1193_v6 = vmul.f32 %v1870_v44, %v2199_v61 }
  0x5d   : > { %v1527_v16 = vadd.f32 %v1526_v40, %v1525_v3  ;;  %v724_v62 = vadd.f32 %v692_v25, %v624_v50  ;;  %v1024_v34 = vadd.f32 %v992_v22, %v923_v36  ;;  %v493_v14 = vmul.f32 %v2108_v10, %v1845_v31  ;;  %v2214_v22 = vld [vmem:[#allocation2 + $0xb0] sm:$0xff] }
  0x5e   : > { %v593_v63 = vmul.f32 %v2114_v23, %v1847_v32  ;;  %v1362_v58 = vmax.f32 %v1330_v53, 0.0  ;;  %v1261_v60 = vmul.f32 %v1984_v59, %v1223_v52  ;;  %v693_v2 = vmul.f32 %v2160_v17, %v1849_v33 }
  0x5f   : > { %v824_v11 = vadd.f32 %v792_v47, %v724_v62  ;;  %v1124_v3 = vadd.f32 %v1092_v1, %v1024_v34  ;;  %v525_v7 = vadd.f32 %v493_v14, %v393_v41  ;;  %v793_v42 = vmul.f32 %v2162_v5, %v1857_v37  ;;  %v2244_v14 = vld [vmem:[#allocation2 + $0xc0] sm:$0xff] }
  0x60   : > { %v893_v9 = vmul.f32 %v2168_v12, %v1859_v38  ;;  %v1394_v10 = vmin.f32 %v1362_v58, 6.0  ;;  %v1299_v23 = vadd.f32 %v2003_v45, %v1261_v60  ;;  %v994_v46 = vmul.f32 %v1861_v39, %v2214_v22 }
  0x61   : > { %v924_v56 = vadd.f32 %v892_v35, %v824_v11  ;;  %v1224_v24 = vadd.f32 %v1192_v15, %v1124_v3  ;;  %v625_v1 = vadd.f32 %v593_v63, %v525_v7  ;;  %v1094_v54 = vmul.f32 %v1868_v43, %v2219_v13 }
  0x62   : > { %v394_v18 = vmul.f32 %v2128_v28, %v1837_v27  ;;  %v1426_v26 = vmul.f32 0.16666667, %v1394_v10  ;;  %v1331_v57 = vadd.f32 3.0, %v1299_v23  ;;  %v494_v19 = vmul.f32 %v2137_v49, %v1845_v31  ;;  %v2232_v28 = vld [vmem:[#allocation2 + $0xb2] sm:$0xff] }
  0x63   : > { %v1025_v4 = vadd.f32 %v993_v48, %v924_v56  ;;  %v1262_v25 = vmul.f32 %v1984_v59, %v1224_v24  ;;  %v725_v20 = vadd.f32 %v693_v2, %v625_v1  ;;  %v594_v15 = vmul.f32 %v2141_v21, %v1847_v32  ;;  %v2249_v2 = vld [vmem:[#allocation2 + $0xc1] sm:$0xff] }
  0x64   : > { %v694_v29 = vmul.f32 %v2185_v0, %v1849_v33  ;;  %v1458_v47 = vmul.f32 %v1426_v26, %v1298_v8  ;;  %v1363_v35 = vmax.f32 %v1331_v57, 0.0  ;;  %v526_v50 = vadd.f32 %v494_v19, %v394_v18  ;;  %v2265_v57 = vld [vmem:[#allocation2 + $0xc2] sm:$0xff] }
  0x65   : > { %v1125_v55 = vadd.f32 %v1093_v30, %v1025_v4  ;;  %v1300_v48 = vadd.f32 %v2003_v45, %v1262_v25  ;;  %v825_v40 = vadd.f32 %v793_v42, %v725_v20  ;;  %v1194_v49 = vmul.f32 %v1870_v44, %v2232_v28 }
  0x66   : > { %v794_v36 = vmul.f32 %v2190_v51, %v1857_v37  ;;  %1490 = vst.msk [vmem:[%s2056_s12 + $0x38] sm:$0xff] %vm271_vm0, %v1458_v47  ;;  %v1528_v21 = vsel %vm271_vm0, %v1458_v47, 0.0  ;;  %v1395_v41 = vmin.f32 %v1363_v35, 6.0  ;;  %v626_v53 = vadd.f32 %v594_v15, %v526_v50  ;;  %v2274_v50 = vld [vmem:[#allocation2 + $0xc8] sm:$0xff] }
  0x67   : > { %v1225_v8 = vadd.f32 %v1193_v6, %v1125_v55  ;;  %v1529_v30 = vadd.f32 %v1528_v21, %v1527_v16  ;;  %v1332_v52 = vadd.f32 3.0, %v1300_v48  ;;  %v925_v62 = vadd.f32 %v893_v9, %v825_v40 }
  0x68   : > { %v894_v34 = vmul.f32 %v2199_v61, %v1859_v38  ;;  %v1427_v63 = vmul.f32 0.16666667, %v1395_v41  ;;  %v726_v60 = vadd.f32 %v694_v29, %v626_v53  ;;  %v995_v11 = vmul.f32 %v1861_v39, %v2244_v14 }
  0x69   : > { %v1263_v58 = vmul.f32 %v1984_v59, %v1225_v8  ;;  %v1364_v6 = vmax.f32 %v1332_v52, 0.0  ;;  %v1026_v3 = vadd.f32 %v994_v46, %v925_v62  ;;  %v1095_v16 = vmul.f32 %v1868_v43, %v2249_v2 }
  0x6a   : > { %v395_v7 = vmul.f32 %v2160_v17, %v1837_v27  ;;  %v1459_v42 = vmul.f32 %v1427_v63, %v1299_v23  ;;  %v826_v10 = vadd.f32 %v794_v36, %v726_v60  ;;  %v495_v56 = vmul.f32 %v2162_v5, %v1845_v31 }
  0x6b   : > { %v1301_v9 = vadd.f32 %v2003_v45, %v1263_v58  ;;  %v1396_v24 = vmin.f32 %v1364_v6, 6.0  ;;  %v1126_v1 = vadd.f32 %v1094_v54, %v1026_v3  ;;  %v595_v18 = vmul.f32 %v2168_v12, %v1847_v32  ;;  %v2286_v58 = vld [vmem:[#allocation2 + $0xc9] sm:$0xff] }
  0x6c   : > { %v695_v46 = vmul.f32 %v2214_v22, %v1849_v33  ;;  %1491 = vst.msk [vmem:[%s2056_s12 + $0x40] sm:$0xff] %vm271_vm0, %v1459_v42  ;;  %v1530_v26 = vsel %vm271_vm0, %v1459_v42, 0.0  ;;  %v926_v23 = vadd.f32 %v894_v34, %v826_v10  ;;  %v527_v4 = vadd.f32 %v495_v56, %v395_v7  ;;  %v2295_v7 = vld [vmem:[#allocation2 + $0xca] sm:$0xff] }
  0x6d   : > { %v1333_v17 = vadd.f32 3.0, %v1301_v9  ;;  %v1531_v19 = vadd.f32 %v1530_v26, %v1529_v30  ;;  %v1428_v5 = vmul.f32 0.16666667, %v1396_v24  ;;  %v1226_v25 = vadd.f32 %v1194_v49, %v1126_v1 }
  0x6e   : > { %v1195_v54 = vmul.f32 %v1870_v44, %v2265_v57  ;;  %v1027_v20 = vadd.f32 %v995_v11, %v926_v23  ;;  %v627_v15 = vadd.f32 %v595_v18, %v527_v4  ;;  %v795_v29 = vmul.f32 %v2219_v13, %v1857_v37 }
  0x6f   : > { %v1365_v12 = vmax.f32 %v1333_v17, 0.0  ;;  %v1460_v47 = vmul.f32 %v1428_v5, %v1300_v48  ;;  %v1264_v35 = vmul.f32 %v1984_v59, %v1226_v25  ;;  %v895_v55 = vmul.f32 %v2232_v28, %v1859_v38  ;;  %v2311_v25 = vld [vmem:[#allocation2 + $0xd9] sm:$0xff] }
  0x70   : > { %v1127_v36 = vadd.f32 %v1095_v16, %v1027_v20  ;;  %v727_v49 = vadd.f32 %v695_v46, %v627_v15  ;;  %v996_v21 = vmul.f32 %v1861_v39, %v2274_v50  ;;  %v396_v48 = vmul.f32 %v2185_v0, %v1837_v27  ;;  %v2307_v46 = vld [vmem:[#allocation2 + $0xd8] sm:$0xff] }
  0x71   : > { %v1397_v40 = vmin.f32 %v1365_v12, 6.0  ;;  %1492 = vst.msk [vmem:[%s2056_s12 + $0x48] sm:$0xff] %vm271_vm0, %v1460_v47  ;;  %v1532_v41 = vsel %vm271_vm0, %v1460_v47, 0.0  ;;  %v1302_v8 = vadd.f32 %v2003_v45, %v1264_v35  ;;  %v496_v53 = vmul.f32 %v2190_v51, %v1845_v31 }
  0x72   : > { %v1533_v30 = vadd.f32 %v1532_v41, %v1531_v19  ;;  %v1227_v62 = vadd.f32 %v1195_v54, %v1127_v36  ;;  %v827_v34 = vadd.f32 %v795_v29, %v727_v49  ;;  %v596_v11 = vmul.f32 %v2199_v61, %v1847_v32 }
  0x73   : > { %v1429_v52 = vmul.f32 0.16666667, %v1397_v40  ;;  %v1334_v63 = vadd.f32 3.0, %v1302_v8  ;;  %v528_v60 = vadd.f32 %v496_v53, %v396_v48  ;;  %v696_v6 = vmul.f32 %v2244_v14, %v1849_v33  ;;  %v2321_v40 = vld [vmem:[#allocation2 + $0xda] sm:$0xff] }
  0x74   : > { %v1265_v0 = vmul.f32 %v1984_v59, %v1227_v62  ;;  %v927_v16 = vadd.f32 %v895_v55, %v827_v34  ;;  %v1096_v51 = vmul.f32 %v1868_v43, %v2286_v58  ;;  %v1196_v10 = vmul.f32 %v1870_v44, %v2295_v7 }
  0x75   : > { %v1461_v3 = vmul.f32 %v1429_v52, %v1301_v9  ;;  %v1366_v42 = vmax.f32 %v1334_v63, 0.0  ;;  %v628_v56 = vadd.f32 %v596_v11, %v528_v60  ;;  %v796_v61 = vmul.f32 %v2249_v2, %v1857_v37  ;;  %v2332_v52 = vld [vmem:[#allocation2 + $0xe0] sm:$0xff] }
  0x76   : > { %v1303_v24 = vadd.f32 %v2003_v45, %v1265_v0  ;;  %v1028_v1 = vadd.f32 %v996_v21, %v927_v16  ;;  %v896_v18 = vmul.f32 %v2265_v57, %v1859_v38  ;;  %v997_v4 = vmul.f32 %v1861_v39, %v2307_v46  ;;  %v2342_v0 = vld [vmem:[#allocation2 + $0xe1] sm:$0xff] }
  0x77   : > { %1493 = vst.msk [vmem:[%s2056_s12 + $0x50] sm:$0xff] %vm271_vm0, %v1461_v3  ;;  %v1534_v9 = vsel %vm271_vm0, %v1461_v3, 0.0  ;;  %v1398_v17 = vmin.f32 %v1366_v42, 6.0  ;;  %v728_v23 = vadd.f32 %v696_v6, %v628_v56  ;;  %v397_v54 = vmul.f32 %v2214_v22, %v1837_v27  ;;  %v2346_v42 = vld [vmem:[#allocation2 + $0xe2] sm:$0xff] }
  0x78   : > { %v1535_v26 = vadd.f32 %v1534_v9, %v1533_v30  ;;  %v1335_v19 = vadd.f32 3.0, %v1303_v24  ;;  %v1128_v5 = vadd.f32 %v1096_v51, %v1028_v1  ;;  %v497_v12 = vmul.f32 %v2219_v13, %v1845_v31 }
  0x79   : > { %v1430_v20 = vmul.f32 0.16666667, %v1398_v17  ;;  %v828_v15 = vadd.f32 %v796_v61, %v728_v23  ;;  %v1097_v29 = vmul.f32 %v1868_v43, %v2311_v25  ;;  %v597_v47 = vmul.f32 %v2232_v28, %v1847_v32 }
  0x7a   : > { %v1367_v35 = vmax.f32 %v1335_v19, 0.0  ;;  %v1228_v55 = vadd.f32 %v1196_v10, %v1128_v5  ;;  %v529_v36 = vadd.f32 %v497_v12, %v397_v54  ;;  %v697_v22 = vmul.f32 %v2274_v50, %v1849_v33  ;;  %v2363_v19 = vld [vmem:[#allocation2 + $0xf0] sm:$0xff] }
  0x7b   : > { %v1462_v49 = vmul.f32 %v1430_v20, %v1302_v8  ;;  %v928_v21 = vadd.f32 %v896_v18, %v828_v15  ;;  %v1197_v13 = vmul.f32 %v1870_v44, %v2321_v40  ;;  %v797_v41 = vmul.f32 %v2286_v58, %v1857_v37 }
  0x7c   : > { %v1399_v48 = vmin.f32 %v1367_v35, 6.0  ;;  %v1266_v53 = vmul.f32 %v1984_v59, %v1228_v55  ;;  %v629_v28 = vadd.f32 %v597_v47, %v529_v36  ;;  %v897_v30 = vmul.f32 %v2295_v7, %v1859_v38  ;;  %v2368_v47 = vld [vmem:[#allocation2 + $0xf1] sm:$0xff] }
  0x7d   : > { %1494 = vst.msk [vmem:[%s2056_s12 + $0x58] sm:$0xff] %vm271_vm0, %v1462_v49  ;;  %v1536_v8 = vsel %vm271_vm0, %v1462_v49, 0.0  ;;  %v1029_v62 = vadd.f32 %v997_v4, %v928_v21  ;;  %v998_v34 = vmul.f32 %v1861_v39, %v2332_v52  ;;  %v398_v63 = vmul.f32 %v2244_v14, %v1837_v27 }
  0x7e   : > { %v1537_v60 = vadd.f32 %v1536_v8, %v1535_v26  ;;  %v1431_v11 = vmul.f32 0.16666667, %v1399_v48  ;;  %v1304_v6 = vadd.f32 %v2003_v45, %v1266_v53  ;;  %v729_v3 = vadd.f32 %v697_v22, %v629_v28  ;;  %v2379_v48 = vld [vmem:[#allocation2 + $0xf2] sm:$0xff] }
  0x7f   : > { %v1129_v16 = vadd.f32 %v1097_v29, %v1029_v62  ;;  %v1098_v51 = vmul.f32 %v1868_v43, %v2342_v0  ;;  %v498_v10 = vmul.f32 %v2249_v2, %v1845_v31  ;;  %v598_v14 = vmul.f32 %v2265_v57, %v1847_v32 }
  0x80   : > { %v1463_v56 = vmul.f32 %v1431_v11, %v1303_v24  ;;  %v1336_v61 = vadd.f32 3.0, %v1304_v6  ;;  %v829_v9 = vadd.f32 %v797_v41, %v729_v3  ;;  %v1198_v1 = vmul.f32 %v1870_v44, %v2346_v42 }
  0x81   : > { %v1229_v18 = vadd.f32 %v1197_v13, %v1129_v16  ;;  %v530_v26 = vadd.f32 %v498_v10, %v398_v63  ;;  %v698_v17 = vmul.f32 %v2307_v46, %v1849_v33  ;;  %v798_v23 = vmul.f32 %v2311_v25, %v1857_v37 }
  0x82   : > { %1495 = vst.msk [vmem:[%s2056_s12 + $0x60] sm:$0xff] %vm271_vm0, %v1463_v56  ;;  %v1538_v2 = vsel %vm271_vm0, %v1463_v56, 0.0  ;;  %v1368_v4 = vmax.f32 %v1336_v61, 0.0  ;;  %v929_v57 = vadd.f32 %v897_v30, %v829_v9  ;;  %v898_v24 = vmul.f32 %v2321_v40, %v1859_v38 }
  0x83   : > { %v1539_v5 = vadd.f32 %v1538_v2, %v1537_v60  ;;  %v1267_v54 = vmul.f32 %v1984_v59, %v1229_v18  ;;  %v630_v12 = vadd.f32 %v598_v14, %v530_v26  ;;  %v999_v20 = vmul.f32 %v1861_v39, %v2363_v19  ;;  %v2389_v60 = vld [vmem:[#allocation2 + $0xf8] sm:$0xff] }
  0x84   : > { %v1400_v15 = vmin.f32 %v1368_v4, 6.0  ;;  %v1030_v29 = vadd.f32 %v998_v34, %v929_v57  ;;  %v399_v35 = vmul.f32 %v2274_v50, %v1837_v27  ;;  %v499_v55 = vmul.f32 %v2286_v58, %v1845_v31 }
  0x85   : > { %v1305_v36 = vadd.f32 %v2003_v45, %v1267_v54  ;;  %v730_v22 = vadd.f32 %v698_v17, %v630_v12  ;;  %v1099_v49 = vmul.f32 %v1868_v43, %v2368_v47  ;;  %v599_v21 = vmul.f32 %v2295_v7, %v1847_v32 }
  0x86   : > { %v1432_v13 = vmul.f32 0.16666667, %v1400_v15  ;;  %v1130_v41 = vadd.f32 %v1098_v51, %v1030_v29  ;;  %v531_v53 = vadd.f32 %v499_v55, %v399_v35  ;;  %v699_v50 = vmul.f32 %v2332_v52, %v1849_v33  ;;  %v2416_v15 = vld [vmem:[#allocation2 + $0x108] sm:$0xff] }
  0x87   : > { %v1337_v28 = vadd.f32 3.0, %v1305_v36  ;;  %v830_v58 = vadd.f32 %v798_v23, %v730_v22  ;;  %v1199_v30 = vmul.f32 %v1870_v44, %v2379_v48  ;;  %v799_v8 = vmul.f32 %v2342_v0, %v1857_v37  ;;  %v2406_v23 = vld [vmem:[#allocation2 + $0xfa] sm:$0xff] }
  0x88   : > { %v1464_v62 = vmul.f32 %v1432_v13, %v1304_v6  ;;  %v1230_v34 = vadd.f32 %v1198_v1, %v1130_v41  ;;  %v631_v7 = vadd.f32 %v599_v21, %v531_v53  ;;  %v899_v63 = vmul.f32 %v2346_v42, %v1859_v38 }
  0x89   : > { %v1369_v11 = vmax.f32 %v1337_v28, 0.0  ;;  %v930_v3 = vadd.f32 %v898_v24, %v830_v58  ;;  %v1000_v16 = vmul.f32 %v1861_v39, %v2389_v60  ;;  %v400_v51 = vmul.f32 %v2307_v46, %v1837_v27  ;;  %v2404_v46 = vld [vmem:[#allocation2 + $0xf9] sm:$0xff] }
  0x8a   : > { %1496 = vst.msk [vmem:[%s2056_s12 + $0x68] sm:$0xff] %vm271_vm0, %v1464_v62  ;;  %v1540_v10 = vsel %vm271_vm0, %v1464_v62, 0.0  ;;  %v1268_v6 = vmul.f32 %v1984_v59, %v1230_v34  ;;  %v731_v14 = vadd.f32 %v699_v50, %v631_v7  ;;  %v500_v56 = vmul.f32 %v2311_v25, %v1845_v31  ;;  %v2432_v34 = vld [vmem:[#allocation2 + $0x109] sm:$0xff] }
  0x8b   : > { %v1541_v61 = vadd.f32 %v1540_v10, %v1539_v5  ;;  %v1401_v9 = vmin.f32 %v1369_v11, 6.0  ;;  %v1031_v1 = vadd.f32 %v999_v20, %v930_v3  ;;  %v600_v18 = vmul.f32 %v2321_v40, %v1847_v32 }
  0x8c   : > { %v1306_v26 = vadd.f32 %v2003_v45, %v1268_v6  ;;  %v831_v17 = vadd.f32 %v799_v8, %v731_v14  ;;  %v532_v2 = vadd.f32 %v500_v56, %v400_v51  ;;  %v700_v4 = vmul.f32 %v2363_v19, %v1849_v33 }
  0x8d   : > { %v1433_v57 = vmul.f32 0.16666667, %v1401_v9  ;;  %v1131_v24 = vadd.f32 %v1099_v49, %v1031_v1  ;;  %v1100_v25 = vmul.f32 %v1868_v43, %v2404_v46  ;;  %v1200_v40 = vmul.f32 %v1870_v44, %v2406_v23 }
  0x8e   : > { %v1338_v5 = vadd.f32 3.0, %v1306_v26  ;;  %v931_v54 = vadd.f32 %v899_v63, %v831_v17  ;;  %v632_v12 = vadd.f32 %v600_v18, %v532_v2  ;;  %v800_v20 = vmul.f32 %v2368_v47, %v1857_v37  ;;  %v2437_v63 = vld [vmem:[#allocation2 + $0x10a] sm:$0xff] }
  0x8f   : > { %v1465_v29 = vmul.f32 %v1433_v57, %v1305_v36  ;;  %v1231_v35 = vadd.f32 %v1199_v30, %v1131_v24  ;;  %v900_v55 = vmul.f32 %v2379_v48, %v1859_v38  ;;  %v1001_v22 = vmul.f32 %v1861_v39, %v2416_v15 }
  0x90   : > { %v1370_v49 = vmax.f32 %v1338_v5, 0.0  ;;  %v1032_v21 = vadd.f32 %v1000_v16, %v931_v54  ;;  %v732_v13 = vadd.f32 %v700_v4, %v632_v12  ;;  %v401_v41 = vmul.f32 %v2332_v52, %v1837_v27 }
  0x91   : > { %1497 = vst.msk [vmem:[%s2056_s12 + $0x70] sm:$0xff] %vm271_vm0, %v1465_v29  ;;  %v1542_v53 = vsel %vm271_vm0, %v1465_v29, 0.0  ;;  %v1269_v50 = vmul.f32 %v1984_v59, %v1231_v35  ;;  %v501_v36 = vmul.f32 %v2342_v0, %v1845_v31  ;;  %v601_v28 = vmul.f32 %v2346_v42, %v1847_v32  ;;  %v2462_v29 = vld [vmem:[#allocation2 + $0x111] sm:$0xff] }
  0x92   : > { %v1543_v58 = vadd.f32 %v1542_v53, %v1541_v61  ;;  %v1402_v30 = vmin.f32 %v1370_v49, 6.0  ;;  %v1132_v8 = vadd.f32 %v1100_v25, %v1032_v21  ;;  %v832_v62 = vadd.f32 %v800_v20, %v732_v13  ;;  %v2447_v61 = vld [vmem:[#allocation2 + $0x110] sm:$0xff] }
  0x93   : > { %v1307_v52 = vadd.f32 %v2003_v45, %v1269_v50  ;;  %v1101_v7 = vmul.f32 %v1868_v43, %v2432_v34  ;;  %v533_v11 = vadd.f32 %v501_v36, %v401_v41  ;;  %v701_v0 = vmul.f32 %v2389_v60, %v1849_v33  ;;  %v2468_v13 = vld [vmem:[#allocation2 + $0x112] sm:$0xff] }
  0x94   : > { %v1434_v3 = vmul.f32 0.16666667, %v1402_v30  ;;  %v1232_v16 = vadd.f32 %v1200_v40, %v1132_v8  ;;  %v932_v42 = vadd.f32 %v900_v55, %v832_v62  ;;  %v1201_v51 = vmul.f32 %v1870_v44, %v2437_v63 }
  0x95   : > { %v1339_v10 = vadd.f32 3.0, %v1307_v52  ;;  %v633_v6 = vadd.f32 %v601_v28, %v533_v11  ;;  %v801_v14 = vmul.f32 %v2404_v46, %v1857_v37  ;;  %v901_v56 = vmul.f32 %v2406_v23, %v1859_v38 }
  0x96   : > { %v1466_v9 = vmul.f32 %v1434_v3, %v1306_v26  ;;  %v1270_v1 = vmul.f32 %v1984_v59, %v1232_v16  ;;  %v1033_v18 = vadd.f32 %v1001_v22, %v932_v42  ;;  %v1002_v17 = vmul.f32 %v1861_v39, %v2447_v61 }
  0x97   : > { %v1371_v2 = vmax.f32 %v1339_v10, 0.0  ;;  %v733_v4 = vadd.f32 %v701_v0, %v633_v6  ;;  %v402_v57 = vmul.f32 %v2363_v19, %v1837_v27  ;;  %v502_v24 = vmul.f32 %v2368_v47, %v1845_v31 }
  0x98   : > { %1498 = vst.msk [vmem:[%s2056_s12 + $0x78] sm:$0xff] %vm271_vm0, %v1466_v9  ;;  %v1544_v25 = vsel %vm271_vm0, %v1466_v9, 0.0  ;;  %v1308_v26 = vadd.f32 %v2003_v45, %v1270_v1  ;;  %v1133_v40 = vadd.f32 %v1101_v7, %v1033_v18  ;;  %v602_v5 = vmul.f32 %v2379_v48, %v1847_v32 }
  0x99   : > { %v1545_v54 = vadd.f32 %v1544_v25, %v1543_v58  ;;  %v1403_v12 = vmin.f32 %v1371_v2, 6.0  ;;  %v833_v20 = vadd.f32 %v801_v14, %v733_v4  ;;  %v534_v35 = vadd.f32 %v502_v24, %v402_v57  ;;  %v2477_v58 = vld [vmem:[#allocation2 + $0x120] sm:$0xff] }
  0x9a   : > { %v1340_v19 = vadd.f32 3.0, %v1308_v26  ;;  %v1233_v55 = vadd.f32 %v1201_v51, %v1133_v40  ;;  %v1102_v47 = vmul.f32 %v1868_v43, %v2462_v29  ;;  %v702_v22 = vmul.f32 %v2416_v15, %v1849_v33  ;;  %v2497_v2 = vld [vmem:[#allocation2 + $0x122] sm:$0xff]  ;;  %v2504_v57 = vld [vmem:[%s2845_s2] ss:$0 sm:$0xff] }
  0x9b   : > { %v1435_v49 = vmul.f32 0.16666667, %v1403_v12  ;;  %v933_v21 = vadd.f32 %v901_v56, %v833_v20  ;;  %v634_v48 = vadd.f32 %v602_v5, %v534_v35  ;;  %v802_v41 = vmul.f32 %v2432_v34, %v1857_v37  ;;  %v2491_v56 = vld [vmem:[#allocation2 + $0x121] sm:$0xff] }
  0x9c   : > { %v1372_v53 = vmax.f32 %v1340_v19, 0.0  ;;  %v1271_v50 = vmul.f32 %v1984_v59, %v1233_v55  ;;  %v1202_v36 = vmul.f32 %v1870_v44, %v2468_v13  ;;  %v902_v28 = vmul.f32 %v2437_v63, %v1859_v38  ;;  %v2511_v5 = vld [vmem:[#allocation2 + $0x128] sm:$0xff]  ;;  %v2523_v55 = vld [vmem:[%s2846_s3] ss:$0 sm:$0xff] }
  0x9d   : > { %v1467_v30 = vmul.f32 %v1435_v49, %v1307_v52  ;;  %v1034_v8 = vadd.f32 %v1002_v17, %v933_v21  ;;  %v734_v62 = vadd.f32 %v702_v22, %v634_v48  ;;  %v1003_v7 = vmul.f32 %v1861_v39, %v2477_v58 }
  0x9e   : > { %v1404_v11 = vmin.f32 %v1372_v53, 6.0  ;;  %v1309_v0 = vadd.f32 %v2003_v45, %v1271_v50  ;;  %v403_v59 = vmul.f32 %v2389_v60, %v1837_v27  ;;  %v503_v3 = vmul.f32 %v2404_v46, %v1845_v31 }
  0x9f   : > { %1499 = vst.msk [vmem:[%s2056_s12 + $0x80] sm:$0xff] %vm271_vm0, %v1467_v30  ;;  %v1546_v16 = vsel %vm271_vm0, %v1467_v30, 0.0  ;;  %v1134_v42 = vadd.f32 %v1102_v47, %v1034_v8  ;;  %v834_v52 = vadd.f32 %v802_v41, %v734_v62  ;;  %v603_v51 = vmul.f32 %v2406_v23, %v1847_v32  ;;  %v2528_v41 = vld [vmem:[#allocation2 + $0x129] sm:$0xff] }
  0xa0   : > { %v1547_v10 = vadd.f32 %v1546_v16, %v1545_v54  ;;  %v1436_v6 = vmul.f32 0.16666667, %v1404_v11  ;;  %v1341_v14 = vadd.f32 3.0, %v1309_v0  ;;  %v535_v45 = vadd.f32 %v503_v3, %v403_v59  ;;  %v2541_v3 = vld [vmem:[#allocation2 + $0x12a] sm:$0xff] }
  0xa1   : > { %v1234_v60 = vadd.f32 %v1202_v36, %v1134_v42  ;;  %v934_v9 = vadd.f32 %v902_v28, %v834_v52  ;;  %v1103_v46 = vmul.f32 %v1868_v43, %v2491_v56  ;;  %v703_v1 = vmul.f32 %v2447_v61, %v1849_v33 }
  0xa2   : > { %v1468_v18 = vmul.f32 %v1436_v6, %v1308_v26  ;;  %v1373_v17 = vmax.f32 %v1341_v14, 0.0  ;;  %v635_v23 = vadd.f32 %v603_v51, %v535_v45  ;;  %v803_v4 = vmul.f32 %v2462_v29, %v1857_v37  ;;  %v2555_v45 = vld [vmem:[#allocation2 + $0x138] sm:$0xff] }
  0xa3   : > { %v1272_v24 = vmul.f32 %v2504_v57, %v1234_v60  ;;  %v1035_v25 = vadd.f32 %v1003_v7, %v934_v9  ;;  %v1203_v40 = vmul.f32 %v1870_v44, %v2497_v2  ;;  %v903_v26 = vmul.f32 %v2468_v13, %v1859_v38 }
  0xa4   : > { %1500 = vst.msk [vmem:[%s2056_s12 + $0x88] sm:$0xff] %vm271_vm0, %v1468_v18  ;;  %v1548_v54 = vsel %vm271_vm0, %v1468_v18, 0.0  ;;  %v1405_v12 = vmin.f32 %v1373_v17, 6.0  ;;  %v735_v20 = vadd.f32 %v703_v1, %v635_v23  ;;  %v1004_v35 = vmul.f32 %v1861_v39, %v2511_v5 }
  0xa5   : > { %v2518_v19 = vadd.f32 %v1548_v54, %v1547_v10  ;;  %v1310_v47 = vadd.f32 %v2523_v55, %v1272_v24  ;;  %v1135_v22 = vadd.f32 %v1103_v46, %v1035_v25  ;;  %v404_v49 = vmul.f32 %v2416_v15, %v1837_v27  ;;  %v2572_v54 = vld [vmem:[#allocation2 + $0x13a] sm:$0xff] }
  0xa6   : > { %v1437_v21 = vmul.f32 0.16666667, %v1405_v12  ;;  %v835_v48 = vadd.f32 %v803_v4, %v735_v20  ;;  %v504_v53 = vmul.f32 %v2432_v34, %v1845_v31  ;;  %v604_v50 = vmul.f32 %v2437_v63, %v1847_v32  ;;  %v2563_v4 = vld [vmem:[#allocation2 + $0x139] sm:$0xff] }
  0xa7   : > { %v1342_v36 = vadd.f32 3.0, %v1310_v47  ;;  %v1235_v28 = vadd.f32 %v1203_v40, %v1135_v22  ;;  %v1104_v30 = vmul.f32 %v1868_v43, %v2528_v41  ;;  %v704_v7 = vmul.f32 %v2477_v58, %v1849_v33 }
  0xa8   : > { %v2536_v8 = vmul.f32 %v1437_v21, %v1309_v0  ;;  %v935_v62 = vadd.f32 %v903_v26, %v835_v48  ;;  %v536_v15 = vadd.f32 %v504_v53, %v404_v49  ;;  %v1204_v63 = vmul.f32 %v1870_v44, %v2541_v3 }
  0xa9   : > { %v1374_v11 = vmax.f32 %v1342_v36, 0.0  ;;  %v1273_v59 = vmul.f32 %v2504_v57, %v1235_v28  ;;  %v804_v0 = vmul.f32 %v2491_v56, %v1857_v37  ;;  %v904_v51 = vmul.f32 %v2497_v2, %v1859_v38  ;;  %v2588_v28 = vld [vmem:[#allocation2 + $0x140] sm:$0xff] }
  0xaa   : > { %1501 = vst.msk [vmem:[%s2056_s12 + $0x90] sm:$0xff] %vm271_vm0, %v2536_v8  ;;  %v1036_v34 = vadd.f32 %v1004_v35, %v935_v62  ;;  %v636_v16 = vadd.f32 %v604_v50, %v536_v15  ;;  %v405_v10 = vmul.f32 %v2447_v61, %v1837_v27  ;;  %v505_v60 = vmul.f32 %v2462_v29, %v1845_v31 }
  0xab   : > { %v1406_v42 = vmin.f32 %v1374_v11, 6.0  ;;  %v1311_v52 = vadd.f32 %v2523_v55, %v1273_v59  ;;  %v605_v9 = vmul.f32 %v2468_v13, %v1847_v32  ;;  %v1005_v18 = vmul.f32 %v1861_v39, %v2555_v45 }
  0xac   : > { %v1136_v6 = vadd.f32 %v1104_v30, %v1036_v34  ;;  %v736_v14 = vadd.f32 %v704_v7, %v636_v16  ;;  %v537_v61 = vadd.f32 %v505_v60, %v405_v10  ;;  %v705_v24 = vmul.f32 %v2511_v5, %v1849_v33  ;;  %v2598_v34 = vld [vmem:[#allocation2 + $0x141] sm:$0xff] }
  0xad   : > { %v1438_v46 = vmul.f32 0.16666667, %v1406_v42  ;;  %v1343_v1 = vadd.f32 3.0, %v1311_v52  ;;  %v1105_v13 = vmul.f32 %v1868_v43, %v2563_v4  ;;  %v805_v20 = vmul.f32 %v2528_v41, %v1857_v37 }
  0xae   : > { %v1236_v17 = vadd.f32 %v1204_v63, %v1136_v6  ;;  %v836_v23 = vadd.f32 %v804_v0, %v736_v14  ;;  %v637_v12 = vadd.f32 %v605_v9, %v537_v61  ;;  %v406_v22 = vmul.f32 %v2477_v58, %v1837_v27 }
  0xaf   : > { %v2567_v25 = vmul.f32 %v1438_v46, %v1310_v47  ;;  %v1375_v29 = vmax.f32 %v1343_v1, 0.0  ;;  %v1205_v47 = vmul.f32 %v1870_v44, %v2572_v54  ;;  %v506_v49 = vmul.f32 %v2491_v56, %v1845_v31 }
  0xb0   : > { %v1274_v40 = vmul.f32 %v2504_v57, %v1236_v17  ;;  %v936_v26 = vadd.f32 %v904_v51, %v836_v23  ;;  %v737_v53 = vadd.f32 %v705_v24, %v637_v12  ;;  %v905_v50 = vmul.f32 %v2541_v3, %v1859_v38 }
  0xb1   : > { %1502 = vst.msk [vmem:[%s2056_s12 + $0x98] sm:$0xff] %vm271_vm0, %v2567_v25  ;;  %v1407_v35 = vmin.f32 %v1375_v29, 6.0  ;;  %v538_v30 = vadd.f32 %v506_v49, %v406_v22  ;;  %v606_v62 = vmul.f32 %v2497_v2, %v1847_v32  ;;  %v706_v58 = vmul.f32 %v2555_v45, %v1849_v33 }
  0xb2   : > { %v1312_v21 = vadd.f32 %v2523_v55, %v1274_v40  ;;  %v1037_v48 = vadd.f32 %v1005_v18, %v936_v26  ;;  %v837_v7 = vadd.f32 %v805_v20, %v737_v53  ;;  %v1006_v11 = vmul.f32 %v1861_v39, %v2588_v28  ;;  %v2628_v26 = vld [vmem:[#allocation2 + $0x151] sm:$0xff] }
  0xb3   : > { %v1439_v36 = vmul.f32 0.16666667, %v1407_v35  ;;  %v638_v63 = vadd.f32 %v606_v62, %v538_v30  ;;  %v806_v16 = vmul.f32 %v2563_v4, %v1857_v37  ;;  %v1106_v51 = vmul.f32 %v1868_v43, %v2598_v34  ;;  %v2632_v35 = vld [vmem:[#allocation2 + $0x152] sm:$0xff] }
  0xb4   : > { %v1344_v15 = vadd.f32 3.0, %v1312_v21  ;;  %v1137_v56 = vadd.f32 %v1105_v13, %v1037_v48  ;;  %v937_v2 = vadd.f32 %v905_v50, %v837_v7  ;;  %v1550_v10 = vsel %vm271_vm0, %v2536_v8, 0.0  ;;  %v2618_v8 = vld [vmem:[#allocation2 + $0x150] sm:$0xff] }
  0xb5   : > { %v2596_v59 = vmul.f32 %v1439_v36, %v1311_v52  ;;  %v2609_v52 = vld [vmem:[#allocation2 + $0x142] sm:$0xff]  ;;  %v738_v6 = vadd.f32 %v706_v58, %v638_v63  ;;  %v906_v14 = vmul.f32 %v2572_v54, %v1859_v38  ;;  %v407_v60 = vmul.f32 %v2511_v5, %v1837_v27  ;;  %v2657_v63 = vld [vmem:[#allocation2 + $0x158] sm:$0xff] }
  0xb6   : > { %v1376_v0 = vmax.f32 %v1344_v15, 0.0  ;;  %v1237_v42 = vadd.f32 %v1205_v47, %v1137_v56  ;;  %v1038_v1 = vadd.f32 %v1006_v11, %v937_v2  ;;  %v1206_v18 = vmul.f32 %v1870_v44, %v2609_v52 }
  0xb7   : > { %1503 = vst.msk [vmem:[%s2056_s12 + $0xa0] sm:$0xff] %vm271_vm0, %v2596_v59  ;;  %v838_v17 = vadd.f32 %v806_v16, %v738_v6  ;;  %v1007_v23 = vmul.f32 %v1861_v39, %v2618_v8  ;;  %v507_v61 = vmul.f32 %v2528_v41, %v1845_v31  ;;  %v607_v24 = vmul.f32 %v2541_v3, %v1847_v32  ;;  %v2659_v16 = vld [vmem:[#allocation2 + $0x159] sm:$0xff] }
  0xb8   : > { %v1408_v9 = vmin.f32 %v1376_v0, 6.0  ;;  %v1275_v46 = vmul.f32 %v2504_v57, %v1237_v42  ;;  %v1551_v5 = vadd.f32 %v1550_v10, %v2518_v19  ;;  %v1138_v40 = vadd.f32 %v1106_v51, %v1038_v1 }
  0xb9   : > { %v938_v12 = vadd.f32 %v906_v14, %v838_v17  ;;  %v1107_v20 = vmul.f32 %v1868_v43, %v2628_v26  ;;  %v539_v47 = vadd.f32 %v507_v61, %v407_v60  ;;  %v707_v41 = vmul.f32 %v2588_v28, %v1849_v33  ;;  %v2667_v14 = vld [vmem:[#allocation2 + $0x15a] sm:$0xff] }
  0xba   : > { %v1440_v29 = vmul.f32 0.16666667, %v1408_v9  ;;  %v1313_v13 = vadd.f32 %v2523_v55, %v1275_v46  ;;  %v1238_v22 = vadd.f32 %v1206_v18, %v1138_v40  ;;  %v1207_v49 = vmul.f32 %v1870_v44, %v2632_v35 }
  0xbb   : > { %v1039_v48 = vadd.f32 %v1007_v23, %v938_v12  ;;  %v639_v53 = vadd.f32 %v607_v24, %v539_v47  ;;  %v807_v50 = vmul.f32 %v2598_v34, %v1857_v37  ;;  %v408_v36 = vmul.f32 %v2555_v45, %v1837_v27 }
  0xbc   : > { %v2636_v3 = vmul.f32 %v1440_v29, %v1312_v21  ;;  %v1345_v19 = vadd.f32 3.0, %v1313_v13  ;;  %v1552_v30 = vsel %vm271_vm0, %v2567_v25, 0.0  ;;  %v1276_v62 = vmul.f32 %v2504_v57, %v1238_v22 }
  0xbd   : > { %v508_v58 = vmul.f32 %v2563_v4, %v1845_v31  ;;  %v1139_v15 = vadd.f32 %v1107_v20, %v1039_v48  ;;  %v739_v56 = vadd.f32 %v707_v41, %v639_v53  ;;  %v907_v7 = vmul.f32 %v2609_v52, %v1859_v38  ;;  %v2681_v20 = vld [vmem:[#allocation2 + $0x168] sm:$0xff] }
  0xbe   : > { %1504 = vst.msk [vmem:[%s2056_s12 + $0xa8] sm:$0xff] %vm271_vm0, %v2636_v3  ;;  %v1377_v21 = vmax.f32 %v1345_v19, 0.0  ;;  %v608_v45 = vmul.f32 %v2572_v54, %v1847_v32  ;;  %v1314_v25 = vadd.f32 %v2523_v55, %v1276_v62  ;;  %v708_v42 = vmul.f32 %v2618_v8, %v1849_v33  ;;  %v2692_v53 = vld [vmem:[#allocation2 + $0x169] sm:$0xff] }
  0xbf   : > { %v540_v0 = vadd.f32 %v508_v58, %v408_v36  ;;  %v1239_v4 = vadd.f32 %v1207_v49, %v1139_v15  ;;  %v839_v2 = vadd.f32 %v807_v50, %v739_v56  ;;  %v1008_v51 = vmul.f32 %v1861_v39, %v2657_v63  ;;  %v2700_v58 = vld [vmem:[#allocation2 + $0x16a] sm:$0xff] }
  0xc0   : > { %v1409_v11 = vmin.f32 %v1377_v21, 6.0  ;;  %v1108_v10 = vmul.f32 %v1868_v43, %v2659_v16  ;;  %v1346_v6 = vadd.f32 3.0, %v1314_v25  ;;  %v808_v9 = vmul.f32 %v2628_v26, %v1857_v37 }
  0xc1   : > { %v640_v60 = vadd.f32 %v608_v45, %v540_v0  ;;  %v1277_v46 = vmul.f32 %v2504_v57, %v1239_v4  ;;  %v939_v1 = vadd.f32 %v907_v7, %v839_v2  ;;  %v1208_v18 = vmul.f32 %v1870_v44, %v2667_v14 }
  0xc2   : > { %v1441_v54 = vmul.f32 0.16666667, %v1409_v11  ;;  %v908_v17 = vmul.f32 %v2632_v35, %v1859_v38  ;;  %v1378_v61 = vmax.f32 %v1346_v6, 0.0  ;;  %v409_v29 = vmul.f32 %v2588_v28, %v1837_v27 }
  0xc3   : > { %v740_v24 = vadd.f32 %v708_v42, %v640_v60  ;;  %v1315_v40 = vadd.f32 %v2523_v55, %v1277_v46  ;;  %v1040_v12 = vadd.f32 %v1008_v51, %v939_v1  ;;  %v509_v47 = vmul.f32 %v2598_v34, %v1845_v31 }
  0xc4   : > { %v2676_v23 = vmul.f32 %v1441_v54, %v1313_v13  ;;  %v609_v41 = vmul.f32 %v2609_v52, %v1847_v32  ;;  %v1553_v19 = vadd.f32 %v1552_v30, %v1551_v5  ;;  %v1410_v13 = vmin.f32 %v1378_v61, 6.0 }
  0xc5   : > { %v840_v22 = vadd.f32 %v808_v9, %v740_v24  ;;  %v1009_v28 = vmul.f32 %v1861_v39, %v2681_v20  ;;  %v1347_v49 = vadd.f32 3.0, %v1315_v40  ;;  %v1140_v48 = vadd.f32 %v1108_v10, %v1040_v12  ;;  %v2716_v10 = vld [vmem:[#allocation2 + $0x170] sm:$0xff] }
  0xc6   : > { %1505 = vst.msk [vmem:[%s2056_s12 + $0xb0] sm:$0xff] %vm271_vm0, %v2676_v23  ;;  %v541_v50 = vadd.f32 %v509_v47, %v409_v29  ;;  %v709_v34 = vmul.f32 %v2657_v63, %v1849_v33  ;;  %v1554_v52 = vsel %vm271_vm0, %v2596_v59, 0.0  ;;  %v1442_v5 = vmul.f32 0.16666667, %v1410_v13 }
  0xc7   : > { %v940_v36 = vadd.f32 %v908_v17, %v840_v22  ;;  %v1109_v30 = vmul.f32 %v1868_v43, %v2692_v53  ;;  %v1379_v21 = vmax.f32 %v1347_v49, 0.0  ;;  %v1240_v62 = vadd.f32 %v1208_v18, %v1140_v48  ;;  %v2725_v18 = vld [vmem:[#allocation2 + $0x171] sm:$0xff]  ;;  %v975_v48 = vld [vmem:[#allocation2 + $0x180] sm:$0xff] }
  0xc8   : > { %v641_v15 = vadd.f32 %v609_v41, %v541_v50  ;;  %v809_v56 = vmul.f32 %v2659_v16, %v1857_v37  ;;  %v2704_v7 = vmul.f32 %v1442_v5, %v1314_v25  ;;  %v1209_v59 = vmul.f32 %v1870_v44, %v2700_v58  ;;  %v2736_v41 = vld [vmem:[#allocation2 + $0x172] sm:$0xff] }
  0xc9   : > { %v1041_v45 = vadd.f32 %v1009_v28, %v940_v36  ;;  %v909_v11 = vmul.f32 %v2667_v14, %v1859_v38  ;;  %v1411_v0 = vmin.f32 %v1379_v21, 6.0  ;;  %v1278_v42 = vmul.f32 %v2504_v57, %v1240_v62  ;;  %v1175_v21 = vld [vmem:[#allocation2 + $0x182] sm:$0xff] }
  0xca   : > { %v741_v4 = vadd.f32 %v709_v34, %v641_v15  ;;  %v410_v2 = vmul.f32 %v2618_v8, %v1837_v27  ;;  %v1555_v51 = vadd.f32 %v1554_v52, %v1553_v19  ;;  %1506 = vst.msk [vmem:[%s2056_s12 + $0xb8] sm:$0xff] %vm271_vm0, %v2704_v7  ;;  %v510_v54 = vmul.f32 %v2628_v26, %v1845_v31 }
  0xcb   : > { %v1141_v25 = vadd.f32 %v1109_v30, %v1041_v45  ;;  %v610_v6 = vmul.f32 %v2632_v35, %v1847_v32  ;;  %v1443_v60 = vmul.f32 0.16666667, %v1411_v0  ;;  %v1316_v9 = vadd.f32 %v2523_v55, %v1278_v42  ;;  %v1075_v30 = vld [vmem:[#allocation2 + $0x181] sm:$0xff] }
  0xcc   : > { %v841_v46 = vadd.f32 %v809_v56, %v741_v4  ;;  %v1010_v8 = vmul.f32 %v1861_v39, %v2716_v10  ;;  %v542_v17 = vadd.f32 %v510_v54, %v410_v2  ;;  %v710_v61 = vmul.f32 %v2681_v20, %v1849_v33 }
  0xcd   : > { %v1241_v1 = vadd.f32 %v1209_v59, %v1141_v25  ;;  %v2729_v24 = vmul.f32 %v1443_v60, %v1315_v40  ;;  %v1348_v26 = vadd.f32 3.0, %v1316_v9  ;;  %v1110_v35 = vmul.f32 %v1868_v43, %v2725_v18 }
  0xce   : > { %v941_v29 = vadd.f32 %v909_v11, %v841_v46  ;;  %v1556_v12 = vsel %vm271_vm0, %v2636_v3, 0.0  ;;  %v642_v19 = vadd.f32 %v610_v6, %v542_v17  ;;  %v810_v13 = vmul.f32 %v2692_v53, %v1857_v37 }
  0xcf   : > { %v1279_v47 = vmul.f32 %v2504_v57, %v1241_v1  ;;  %v1557_v22 = vadd.f32 %v1556_v12, %v1555_v51  ;;  %1507 = vst.msk [vmem:[%s2056_s12 + $0xc0] sm:$0xff] %vm271_vm0, %v2729_v24  ;;  %v1380_v40 = vmax.f32 %v1348_v26, 0.0  ;;  %v1210_v49 = vmul.f32 %v1870_v44, %v2736_v41 }
  0xd0   : > { %v1042_v28 = vadd.f32 %v1010_v8, %v941_v29  ;;  %v742_v50 = vadd.f32 %v710_v61, %v642_v19  ;;  %v910_v34 = vmul.f32 %v2700_v58, %v1859_v38  ;;  %v411_v52 = vmul.f32 %v2657_v63, %v1837_v27  ;;  %v976_v8 = vld [vmem:[#allocation2 + $0x188] sm:$0xff] }
  0xd1   : > { %v1317_v3 = vadd.f32 %v2523_v55, %v1279_v47  ;;  %v1412_v5 = vmin.f32 %v1380_v40, 6.0  ;;  %v511_v62 = vmul.f32 %v2659_v16, %v1845_v31  ;;  %v611_v15 = vmul.f32 %v2667_v14, %v1847_v32  ;;  %v1076_v19 = vld [vmem:[#allocation2 + $0x189] sm:$0xff] }
  0xd2   : > { %v1142_v36 = vadd.f32 %v1110_v35, %v1042_v28  ;;  %v1558_v56 = vsel %vm271_vm0, %v2676_v23, 0.0  ;;  %v842_v59 = vadd.f32 %v810_v13, %v742_v50  ;;  %v1011_v11 = vmul.f32 %v1861_v39, %v975_v48  ;;  %v1176_v28 = vld [vmem:[#allocation2 + $0x18a] sm:$0xff] }
  0xd3   : > { %v1349_v45 = vadd.f32 3.0, %v1317_v3  ;;  %v1444_v0 = vmul.f32 0.16666667, %v1412_v5  ;;  %v543_v63 = vadd.f32 %v511_v62, %v411_v52  ;;  %v711_v4 = vmul.f32 %v2716_v10, %v1849_v33 }
  0xd4   : > { %v1242_v42 = vadd.f32 %v1210_v49, %v1142_v36  ;;  %v942_v51 = vadd.f32 %v910_v34, %v842_v59  ;;  %v1111_v16 = vmul.f32 %v1868_v43, %v1075_v30  ;;  %v1211_v14 = vmul.f32 %v1870_v44, %v1175_v21  ;;  %v1077_v59 = vld [vmem:[#allocation2 + $0x199] sm:$0xff] }
  0xd5   : > { %v1381_v2 = vmax.f32 %v1349_v45, 0.0  ;;  %v2761_v25 = vmul.f32 %v1444_v0, %v1316_v9  ;;  %v643_v54 = vadd.f32 %v611_v15, %v543_v63  ;;  %v811_v6 = vmul.f32 %v2725_v18, %v1857_v37 }
  0xd6   : > { %v1280_v23 = vmul.f32 %v2504_v57, %v1242_v42  ;;  %v1043_v46 = vadd.f32 %v1011_v11, %v942_v51  ;;  %v412_v1 = vmul.f32 %v2681_v20, %v1837_v27  ;;  %v512_v17 = vmul.f32 %v2692_v53, %v1845_v31 }
  0xd7   : > { %v1413_v60 = vmin.f32 %v1381_v2, 6.0  ;;  %1508 = vst.msk [vmem:[%s2056_s12 + $0xc8] sm:$0xff] %vm271_vm0, %v2761_v25  ;;  %v743_v61 = vadd.f32 %v711_v4, %v643_v54  ;;  %v911_v26 = vmul.f32 %v2736_v41, %v1859_v38  ;;  %v612_v29 = vmul.f32 %v2700_v58, %v1847_v32  ;;  %v977_v58 = vld [vmem:[#allocation2 + $0x198] sm:$0xff] }
  0xd8   : > { %v1318_v9 = vadd.f32 %v2523_v55, %v1280_v23  ;;  %v1559_v35 = vadd.f32 %v1558_v56, %v1557_v22  ;;  %v1143_v47 = vadd.f32 %v1111_v16, %v1043_v46  ;;  %v544_v20 = vadd.f32 %v512_v17, %v412_v1  ;;  %v1177_v4 = vld [vmem:[#allocation2 + $0x19a] sm:$0xff] }
  0xd9   : > { %v1445_v12 = vmul.f32 0.16666667, %v1413_v60  ;;  %v843_v53 = vadd.f32 %v811_v6, %v743_v61  ;;  %v1012_v40 = vmul.f32 %v1861_v39, %v976_v8  ;;  %v712_v49 = vmul.f32 %v975_v48, %v1849_v33 }
  0xda   : > { %v1350_v13 = vadd.f32 3.0, %v1318_v9  ;;  %v1243_v34 = vadd.f32 %v1211_v14, %v1143_v47  ;;  %v644_v52 = vadd.f32 %v612_v29, %v544_v20  ;;  %v812_v5 = vmul.f32 %v1075_v30, %v1857_v37  ;;  %v978_v29 = vld [vmem:[#allocation2 + $0x1a0] sm:$0xff] }
  0xdb   : > { %v2780_v50 = vmul.f32 %v1445_v12, %v1317_v3  ;;  %v1560_v22 = vsel %vm271_vm0, %v2704_v7, 0.0  ;;  %v943_v62 = vadd.f32 %v911_v26, %v843_v53  ;;  %v1112_v15 = vmul.f32 %v1868_v43, %v1076_v19  ;;  %v1078_v47 = vld [vmem:[#allocation2 + $0x1a1] sm:$0xff] }
  0xdc   : > { %v1382_v36 = vmax.f32 %v1350_v13, 0.0  ;;  %v1281_v56 = vmul.f32 %v2504_v57, %v1243_v34  ;;  %v1212_v48 = vmul.f32 %v1870_v44, %v1176_v28  ;;  %v744_v3 = vadd.f32 %v712_v49, %v644_v52  ;;  %v1178_v49 = vld [vmem:[#allocation2 + $0x1a2] sm:$0xff] }
  0xdd   : > { %1509 = vst.msk [vmem:[%s2056_s12 + $0xd0] sm:$0xff] %vm271_vm0, %v2780_v50  ;;  %v912_v45 = vmul.f32 %v1175_v21, %v1859_v38  ;;  %v1044_v11 = vadd.f32 %v1012_v40, %v943_v62  ;;  %v1013_v0 = vmul.f32 %v1861_v39, %v977_v58  ;;  %v413_v7 = vmul.f32 %v2716_v10, %v1837_v27 }
  0xde   : > { %v1414_v30 = vmin.f32 %v1382_v36, 6.0  ;;  %v1319_v42 = vadd.f32 %v2523_v55, %v1281_v56  ;;  %v844_v63 = vadd.f32 %v812_v5, %v744_v3  ;;  %v513_v2 = vmul.f32 %v2725_v18, %v1845_v31 }
  0xdf   : > { %v613_v51 = vmul.f32 %v2736_v41, %v1847_v32  ;;  %v1561_v16 = vadd.f32 %v1560_v22, %v1559_v35  ;;  %v1144_v14 = vadd.f32 %v1112_v15, %v1044_v11  ;;  %v1113_v23 = vmul.f32 %v1868_v43, %v1077_v59 }
  0xe0   : > { %v1446_v21 = vmul.f32 0.16666667, %v1414_v30  ;;  %v1351_v54 = vadd.f32 3.0, %v1319_v42  ;;  %v944_v6 = vadd.f32 %v912_v45, %v844_v63  ;;  %v545_v60 = vadd.f32 %v513_v2, %v413_v7 }
  0xe1   : > { %v713_v27 = vmul.f32 %v976_v8, %v1849_v33  ;;  %v1562_v10 = vsel %vm271_vm0, %v2729_v24, 0.0  ;;  %v1244_v1 = vadd.f32 %v1212_v48, %v1144_v14  ;;  %v1213_v31 = vmul.f32 %v1870_v44, %v1177_v4 }
  0xe2   : > { %v1478_v46 = vmul.f32 %v1446_v21, %v1318_v9  ;;  %v1383_v18 = vmax.f32 %v1351_v54, 0.0  ;;  %v1045_v32 = vadd.f32 %v1013_v0, %v944_v6  ;;  %v645_v41 = vadd.f32 %v613_v51, %v545_v60 }
  0xe3   : > { %v813_v17 = vmul.f32 %v1076_v19, %v1857_v37  ;;  %v1563_v61 = vadd.f32 %v1562_v10, %v1561_v16  ;;  %v1282_v26 = vmul.f32 %v2504_v57, %v1244_v1  ;;  %v913_v24 = vmul.f32 %v1176_v28, %v1859_v38 }
  0xe4   : > { %1510 = vst.msk [vmem:[%s2056_s12 + $0xd8] sm:$0xff] %vm271_vm0, %v1478_v46  ;;  %v1415_v35 = vmin.f32 %v1383_v18, 6.0  ;;  %v1145_v33 = vadd.f32 %v1113_v23, %v1045_v32  ;;  %v745_v8 = vadd.f32 %v713_v27, %v645_v41  ;;  %v1564_v9 = vsel %vm271_vm0, %v2761_v25, 0.0 }
  0xe5   : > { %v1320_v12 = vadd.f32 %v2523_v55, %v1282_v26  ;;  %v1014_v13 = vmul.f32 %v1861_v39, %v978_v29  ;;  %v1565_v53 = vadd.f32 %v1564_v9, %v1563_v61  ;;  %v1114_v38 = vmul.f32 %v1868_v43, %v1078_v47 }
  0xe6   : > { %v1447_v20 = vmul.f32 0.16666667, %v1415_v35  ;;  %v1245_v37 = vadd.f32 %v1213_v31, %v1145_v33  ;;  %v845_v19 = vadd.f32 %v813_v17, %v745_v8  ;;  %v1566_v25 = vsel %vm271_vm0, %v2780_v50, 0.0 }
  0xe7   : > { %v1352_v40 = vadd.f32 3.0, %v1320_v12  ;;  %v1214_v39 = vmul.f32 %v1870_v44, %v1178_v49  ;;  %v1567_v36 = vadd.f32 %v1566_v25, %v1565_v53  ;;  %v1568_v43 = vsel %vm271_vm0, %v1478_v46, 0.0 }
  0xe8   : > { %v1479_v34 = vmul.f32 %v1447_v20, %v1319_v42  ;;  %v1283_v52 = vmul.f32 %v2504_v57, %v1245_v37  ;;  %v945_v5 = vadd.f32 %v913_v24, %v845_v19 }
  0xe9   : > { %v1384_v28 = vmax.f32 %v1352_v40, 0.0  ;;  %v1569_v59 = vadd.f32 %v1568_v43, %v1567_v36 }
  0xea   : > { %1511 = vst.msk [vmem:[%s2056_s12 + $0xe0] sm:$0xff] %vm271_vm0, %v1479_v34  ;;  %v1321_v58 = vadd.f32 %v2523_v55, %v1283_v52  ;;  %v1046_v22 = vadd.f32 %v1014_v13, %v945_v5  ;;  %v1570_v44 = vsel %vm271_vm0, %v1479_v34, 0.0 }
  0xeb   : > { %v1416_v62 = vmin.f32 %v1384_v28, 6.0  ;;  %v1571_v42 = vadd.f32 %v1570_v44, %v1569_v59 }
  0xec   : > { %v1353_v15 = vadd.f32 3.0, %v1321_v58  ;;  %v1146_v56 = vadd.f32 %v1114_v38, %v1046_v22 }
  0xed   : > { %v1448_v48 = vmul.f32 0.16666667, %v1416_v62 }
  0xee   : > { %v1385_v3 = vmax.f32 %v1353_v15, 0.0  ;;  %v1246_v45 = vadd.f32 %v1214_v39, %v1146_v56 }
  0xef   : > { %v1480_v50 = vmul.f32 %v1448_v48, %v1320_v12 }
  0xf0   : > { %v1417_v30 = vmin.f32 %v1385_v3, 6.0  ;;  %v1284_v11 = vmul.f32 %v2504_v57, %v1246_v45 }
  0xf1   : > { %1512 = vst.msk [vmem:[%s2056_s12 + $0xe8] sm:$0xff] %vm271_vm0, %v1480_v50  ;;  %v1572_v2 = vsel %vm271_vm0, %v1480_v50, 0.0 }
  0xf2   : > { %v1449_v0 = vmul.f32 0.16666667, %v1417_v30  ;;  %v1322_v7 = vadd.f32 %v2523_v55, %v1284_v11  ;;  %v1573_v16 = vadd.f32 %v1572_v2, %v1571_v42 }
  0xf4   : > { %v1481_v63 = vmul.f32 %v1449_v0, %v1321_v58  ;;  %v1354_v4 = vadd.f32 3.0, %v1322_v7 }
  0xf6   : > { %1513 = vst.msk [vmem:[%s2056_s12 + $0xf0] sm:$0xff] %vm271_vm0, %v1481_v63  ;;  %v1386_v51 = vmax.f32 %v1354_v4, 0.0  ;;  %v1574_v57 = vsel %vm271_vm0, %v1481_v63, 0.0 }
  0xf7   : > { %v1575_v23 = vadd.f32 %v1574_v57, %v1573_v16 }
  0xf8   : > { %v1418_v21 = vmin.f32 %v1386_v51, 6.0 }
  0xfa   : > { %v1450_v14 = vmul.f32 0.16666667, %v1418_v21 }
  0xfc   : > { %v1482_v54 = vmul.f32 %v1450_v14, %v1322_v7 }
  0xfe   : > { %1514 = vst.msk [vmem:[%s2056_s12 + $0xf8] sm:$0xff] %vm271_vm0, %v1482_v54  ;;  %v1576_v55 = vsel %vm271_vm0, %v1482_v54, 0.0 }
  0xff   : > { %v1577_v6 = vadd.f32 %v1576_v55, %v1575_v23 }
 0x101   : > { %v1578_v60 = vrot.slane %v1577_v6, 4 }
 0x103   : > { %v1579_v27 = vadd.f32 %v1578_v60, %v1577_v6 }
 0x105   : > { %v1580_v10 = vrot.slane %v1579_v27, 2 }
 0x107   : > { %v1581_v46 = vadd.f32 %v1580_v10, %v1579_v27 }
 0x109   : > { %v1582_v1 = vrot.slane %v1581_v46, 1 }
 0x10b   : > { %v1583_v31 = vadd.f32 %v1582_v1, %v1581_v46 }
 0x10d   : > { %v1584_v18 = vmul.f32 0.00390625, %v1583_v31 }
 0x10f   : > { %1585 = vst.msk [vmem:[%s233_s21] sm:$0x1] %vm281_vm2, %v1584_v18 }
 0x110 PF: > { %s16_s18 = sadd.s32 1, %s1698_s18  }
 0x111   : > { %p13_p4 = scmp.ge.s32.totalorder %s16_s18, 4  }
 0x113   :  { %15 = sbr.rel (!%p13_p4) target bundleno = 1 (0x1), region = 81 }

</bundles_post_ra>
